<compile_context>
chip_gen: v5e
topology: v5e:2x2
jax: 0.10.0
libtpu: 0.0.40
codegen_flags: <defaults>
</compile_context>

<pallas_src>
import jax
import jax.numpy as jnp
from jax.experimental import pallas as pl
from jax.experimental.pallas import tpu as pltpu


# --------------------------- Pallas kernel -----------------------------------

def _sat_kernel(img_ref, wcnn_ref, bcnn_ref, watt_ref, batt_ref,
                emb_ref, wina_ref, wine_ref, bin_ref,
                wih_ref, whh_ref, blstm_ref, wfc_ref, bfc_ref,
                out_ref):
    f32 = jnp.float32
    TB, _E = emb_ref.shape
    H = whh_ref.shape[0]
    B = img_ref.shape[0]
    T = TB // B

    # ---- CNN stand-in -------------------------------------------------------
    # TODO(synk): the pretrained resnet18 backbone has no clean Pallas
    # equivalent; it is replaced by a deterministic global-average-pool over
    # H*W (lane-dense last axis) + linear -> 512 features so attention_fc's
    # 512-d input contract is honored.
    pooled = jnp.mean(img_ref[...], axis=-1)                               # (B, C)
    feats = jnp.dot(pooled, wcnn_ref[...],
                    preferred_element_type=f32) + bcnn_ref[...]            # (B, 512)

    # ---- attention projection (time-invariant, == repeat(1, T, 1)) ----------
    attn = jnp.dot(feats, watt_ref[...],
                   preferred_element_type=f32) + batt_ref[...]             # (B, E)

    # ---- hoisted, batched (over T) projections -------------------------------
    # x_t = attn @ w_in[:E] + e_t @ w_in[E:] + b_in   (== fc_input(cat(attn, e_t)))
    # gates_x_t = x_t @ w_ih + b_lstm
    x_att = jnp.dot(attn, wina_ref[...],
                    preferred_element_type=f32) + bin_ref[...]             # (B, E)
    g_const = jnp.dot(x_att, wih_ref[...],
                      preferred_element_type=f32) + blstm_ref[...]         # (B, 4H)
    x_emb = jnp.dot(emb_ref[...], wine_ref[...],
                    preferred_element_type=f32)                            # (T*B, E)
    g_emb = jnp.dot(x_emb, wih_ref[...],
                    preferred_element_type=f32)                            # (T*B, 4H)

    # ---- LSTM recurrence: only h @ w_hh + elementwise gates per step ---------
    w_hh = whh_ref[...]
    h = jnp.zeros((B, H), f32)
    c = jnp.zeros((B, H), f32)
    hs = []
    for t in range(T):  # static unroll (T is small and compile-time known)
        gates = (g_emb[t * B:(t + 1) * B, :] + g_const
                 + jnp.dot(h, w_hh, preferred_element_type=f32))           # (B, 4H)
        i_g = jax.nn.sigmoid(gates[:, 0:H])
        f_g = jax.nn.sigmoid(gates[:, H:2 * H])
        g_g = jnp.tanh(gates[:, 2 * H:3 * H])
        o_g = jax.nn.sigmoid(gates[:, 3 * H:4 * H])
        c = f_g * c + i_g * g_g
        h = o_g * jnp.tanh(c)
        hs.append(h)

    # ---- batched final FC, single lane-dense store ---------------------------
    h_all = jnp.concatenate(hs, axis=0)                                    # (T*B, H)
    out_ref[...] = (jnp.dot(h_all, wfc_ref[...], preferred_element_type=f32)
                    + bfc_ref[...])                                        # (T*B, Vpad)


# --------------------------- pallas_call wrapper ------------------------------

def _full_spec(shape):
    n = len(shape)
    return pl.BlockSpec(tuple(shape), lambda i, _n=n: (0,) * _n)


def sat_forward(params, images, captions):
    B, C, Hi, Wi = images.shape
    T = captions.shape[1]
    E = params["w_att"].shape[1]
    H = params["w_hh"].shape[0]
    V = params["w_fc"].shape[1]
    Vp = ((V + 127) // 128) * 128

    img3 = images.reshape(B, C, Hi * Wi)                    # lane-dense spatial axis

    # Embedding lookup is a gather: kept as XLA glue.
    emb = params["embedding"][captions]                     # (B, T, E)
    emb_tm = jnp.transpose(emb, (1, 0, 2)).reshape(T * B, E)  # rows ordered t*B + b

    # Split fc_input weight: rows [0:E] hit the attended features, [E:] the embeddings.
    # (Assumes hidden_dim == embedding_dim, same contract as the PyTorch module here.)
    w_in_att = params["w_in"][:E]
    w_in_emb = params["w_in"][E:]

    # Pad vocab dim to a lane multiple for an unmasked lane-dense output store.
    w_fc_p = jnp.pad(params["w_fc"], ((0, 0), (0, Vp - V)))
    b_fc_p = jnp.pad(params["b_fc"], (0, Vp - V)).reshape(1, -1)

    inputs = (
        img3, params["w_cnn"], params["b_cnn"].reshape(1, -1),
        params["w_att"], params["b_att"].reshape(1, -1),
        emb_tm, w_in_att, w_in_emb, params["b_in"].reshape(1, -1),
        params["w_ih"], params["w_hh"], params["b_lstm"].reshape(1, -1),
        w_fc_p, b_fc_p,
    )

    out2d = pl.pallas_call(
        _sat_kernel,
        out_shape=jax.ShapeDtypeStruct((T * B, Vp), jnp.float32),
        grid=(1,),
        in_specs=[_full_spec(x.shape) for x in inputs],
        out_specs=_full_spec((T * B, Vp)),
        compiler_params=pltpu.CompilerParams(dimension_semantics=("arbitrary",)),
    )(*inputs)

    out_tm = out2d.reshape(T, B, Vp)[:, :, :V]              # strip vocab padding
    return jnp.transpose(out_tm, (1, 0, 2))                 # (B, T, V)


# --------------------------- parameters & reference ---------------------------

def init_params(key, vocab_size, embedding_dim=32, hidden_dim=32,
                img_channels=3, feat_dim=512):
    ks = jax.random.split(key, 12)

    def uni(k, shape, fan_in):
        bound = 1.0 / jnp.sqrt(jnp.float32(fan_in))
        return jax.random.uniform(k, shape, jnp.float32, -bound, bound)

    E, Hd = embedding_dim, hidden_dim
    return dict(
        # CNN stand-in (GAP + linear to 512)
        w_cnn=uni(ks[0], (img_channels, feat_dim), img_channels),
        b_cnn=uni(ks[1], (feat_dim,), img_channels),
        # nn.Embedding(vocab, E)
        embedding=jax.random.normal(ks[2], (vocab_size, E), jnp.float32),
        # attention_fc: Linear(512, E)   (stored transposed: (in, out))
        w_att=uni(ks[3], (feat_dim, E), feat_dim),
        b_att=uni(ks[4], (E,), feat_dim),
        # fc_input: Linear(H + E, E)
        w_in=uni(ks[5], (Hd + E, E), Hd + E),
        b_in=uni(ks[6], (E,), Hd + E),
        # LSTM (single layer); b_ih + b_hh folded into one bias
        w_ih=uni(ks[7], (E, 4 * Hd), Hd),
        w_hh=uni(ks[8], (Hd, 4 * Hd), Hd),
        b_lstm=uni(ks[9], (4 * Hd,), Hd),
        # fc: Linear(E, vocab)  (applied to LSTM hidden, H == E)
        w_fc=uni(ks[10], (Hd, vocab_size), E),
        b_fc=uni(ks[11], (vocab_size,), E),
    )


def sat_reference(params, images, captions):
    with jax.default_matmul_precision("highest"):
        pooled = jnp.mean(images, axis=(2, 3))
        feats = pooled @ params["w_cnn"] + params["b_cnn"]
        attn = feats @ params["w_att"] + params["b_att"]
        emb = params["embedding"][captions]
        attn_rep = jnp.broadcast_to(attn[:, None, :], emb.shape)
        cat = jnp.concatenate([attn_rep, emb], axis=-1)
        x = cat @ params["w_in"] + params["b_in"]
        B, T, _ = x.shape
        H = params["w_hh"].shape[0]
        h = jnp.zeros((B, H), jnp.float32)
        c = jnp.zeros((B, H), jnp.float32)
        outs = []
        for t in range(T):
            gates = x[:, t] @ params["w_ih"] + h @ params["w_hh"] + params["b_lstm"]
            i_g = jax.nn.sigmoid(gates[:, :H])
            f_g = jax.nn.sigmoid(gates[:, H:2 * H])
            g_g = jnp.tanh(gates[:, 2 * H:3 * H])
            o_g = jax.nn.sigmoid(gates[:, 3 * H:])
            c = f_g * c + i_g * g_g
            h = o_g * jnp.tanh(c)
            outs.append(h @ params["w_fc"] + params["b_fc"])
        return jnp.stack(outs, axis=1)


# --------------------------------- main ---------------------------------------

if __name__ == "__main__":
    key = jax.random.PRNGKey(0)
    k_param, k_img, k_cap = jax.random.split(key, 3)

    B, C, Hi, Wi = 2, 3, 16, 16
    T = 8
    vocab_size = 50
    E = Hd = 32
    feat_dim = 512

    params = init_params(k_param, vocab_size, E, Hd, C, feat_dim)
    images = jax.random.normal(k_img, (B, C, Hi, Wi), jnp.float32)
    captions = jax.random.randint(k_cap, (B, T), 0, vocab_size, dtype=jnp.int32)

    out = sat_forward(params, images, captions)
    out = jax.block_until_ready(out)

    assert out.shape == (B, T, vocab_size), out.shape
    ref = sat_reference(params, images, captions)
    if not jnp.allclose(out, ref, atol=2e-3, rtol=2e-3):
        raise AssertionError(
            f"kernel/reference mismatch, max abs err {jnp.max(jnp.abs(out - ref))}"
        )
    print("KERNEL_OK")
</pallas_src>

<mosaic_0001>
module attributes {stable_mosaic.version = 11 : i64} {
  func.func @_sat_kernel(%arg0: i32, %arg1: memref<2x3x256xf32, #tpu.memory_space<vmem>>, %arg2: memref<3x512xf32, #tpu.memory_space<vmem>>, %arg3: memref<1x512xf32, #tpu.memory_space<vmem>>, %arg4: memref<512x32xf32, #tpu.memory_space<vmem>>, %arg5: memref<1x32xf32, #tpu.memory_space<vmem>>, %arg6: memref<16x32xf32, #tpu.memory_space<vmem>>, %arg7: memref<32x32xf32, #tpu.memory_space<vmem>>, %arg8: memref<32x32xf32, #tpu.memory_space<vmem>>, %arg9: memref<1x32xf32, #tpu.memory_space<vmem>>, %arg10: memref<32x128xf32, #tpu.memory_space<vmem>>, %arg11: memref<32x128xf32, #tpu.memory_space<vmem>>, %arg12: memref<1x128xf32, #tpu.memory_space<vmem>>, %arg13: memref<32x128xf32, #tpu.memory_space<vmem>>, %arg14: memref<1x128xf32, #tpu.memory_space<vmem>>, %arg15: memref<16x128xf32, #tpu.memory_space<vmem>>) attributes {dimension_semantics = [#tpu.dimension_semantics<arbitrary>], iteration_bounds = array<i64: 1>, scalar_prefetch = 0 : i64, scratch_operands = 0 : i64, tpu.core_type = #tpu.core_type<tc>, window_params = [{pipeline_mode = #tpu.pipeline_mode<synchronous>, transform_indices = @transform_0, window_bounds = array<i64: 2, 3, 256>}, {pipeline_mode = #tpu.pipeline_mode<synchronous>, transform_indices = @transform_1, window_bounds = array<i64: 3, 512>}, {pipeline_mode = #tpu.pipeline_mode<synchronous>, transform_indices = @transform_2, window_bounds = array<i64: 1, 512>}, {pipeline_mode = #tpu.pipeline_mode<synchronous>, transform_indices = @transform_3, window_bounds = array<i64: 512, 32>}, {pipeline_mode = #tpu.pipeline_mode<synchronous>, transform_indices = @transform_4, window_bounds = array<i64: 1, 32>}, {pipeline_mode = #tpu.pipeline_mode<synchronous>, transform_indices = @transform_5, window_bounds = array<i64: 16, 32>}, {pipeline_mode = #tpu.pipeline_mode<synchronous>, transform_indices = @transform_6, window_bounds = array<i64: 32, 32>}, {pipeline_mode = #tpu.pipeline_mode<synchronous>, transform_indices = @transform_7, window_bounds = array<i64: 32, 32>}, {pipeline_mode = #tpu.pipeline_mode<synchronous>, transform_indices = @transform_8, window_bounds = array<i64: 1, 32>}, {pipeline_mode = #tpu.pipeline_mode<synchronous>, transform_indices = @transform_9, window_bounds = array<i64: 32, 128>}, {pipeline_mode = #tpu.pipeline_mode<synchronous>, transform_indices = @transform_10, window_bounds = array<i64: 32, 128>}, {pipeline_mode = #tpu.pipeline_mode<synchronous>, transform_indices = @transform_11, window_bounds = array<i64: 1, 128>}, {pipeline_mode = #tpu.pipeline_mode<synchronous>, transform_indices = @transform_12, window_bounds = array<i64: 32, 128>}, {pipeline_mode = #tpu.pipeline_mode<synchronous>, transform_indices = @transform_13, window_bounds = array<i64: 1, 128>}, {pipeline_mode = #tpu.pipeline_mode<synchronous>, transform_indices = @transform_14, window_bounds = array<i64: 16, 128>}]} {
    %c0 = arith.constant 0 : index
    %c0_0 = arith.constant 0 : index
    %c0_1 = arith.constant 0 : index
    %0 = vector.load %arg1[%c0, %c0_0, %c0_1] : memref<2x3x256xf32, #tpu.memory_space<vmem>>, vector<2x3x256xf32>
    %cst = arith.constant dense<0.000000e+00> : vector<2x3xf32>
    %1 = vector.multi_reduction <add>, %0, %cst [2] : vector<2x3x256xf32> to vector<2x3xf32>
    %cst_2 = arith.constant 2.560000e+02 : f32
    %2 = vector.broadcast %cst_2 : f32 to vector<2x3xf32>
    %3 = arith.divf %1, %2 : vector<2x3xf32>
    %c0_3 = arith.constant 0 : index
    %c0_4 = arith.constant 0 : index
    %4 = vector.load %arg2[%c0_3, %c0_4] : memref<3x512xf32, #tpu.memory_space<vmem>>, vector<3x512xf32>
    %cst_5 = arith.constant dense<0.000000e+00> : vector<2x512xf32>
    %5 = tpu.matmul %3, %4, %cst_5 {dimension_numbers = #tpu.dot_dimension_numbers<[1], [0], [0], [1], [0, 0, 1, 1], [], []>} : vector<2x3xf32>, vector<3x512xf32>, vector<2x512xf32> -> vector<2x512xf32>
    %c0_6 = arith.constant 0 : index
    %c0_7 = arith.constant 0 : index
    %6 = vector.load %arg3[%c0_6, %c0_7] : memref<1x512xf32, #tpu.memory_space<vmem>>, vector<1x512xf32>
    %7 = vector.broadcast %6 : vector<1x512xf32> to vector<2x512xf32>
    %8 = arith.addf %5, %7 : vector<2x512xf32>
    %c0_8 = arith.constant 0 : index
    %c0_9 = arith.constant 0 : index
    %9 = vector.load %arg4[%c0_8, %c0_9] : memref<512x32xf32, #tpu.memory_space<vmem>>, vector<512x32xf32>
    %cst_10 = arith.constant dense<0.000000e+00> : vector<2x32xf32>
    %10 = tpu.matmul %8, %9, %cst_10 {dimension_numbers = #tpu.dot_dimension_numbers<[1], [0], [0], [1], [0, 0, 1, 1], [], []>} : vector<2x512xf32>, vector<512x32xf32>, vector<2x32xf32> -> vector<2x32xf32>
    %c0_11 = arith.constant 0 : index
    %c0_12 = arith.constant 0 : index
    %11 = vector.load %arg5[%c0_11, %c0_12] : memref<1x32xf32, #tpu.memory_space<vmem>>, vector<1x32xf32>
    %12 = vector.broadcast %11 : vector<1x32xf32> to vector<2x32xf32>
    %13 = arith.addf %10, %12 : vector<2x32xf32>
    %c0_13 = arith.constant 0 : index
    %c0_14 = arith.constant 0 : index
    %14 = vector.load %arg7[%c0_13, %c0_14] : memref<32x32xf32, #tpu.memory_space<vmem>>, vector<32x32xf32>
    %cst_15 = arith.constant dense<0.000000e+00> : vector<2x32xf32>
    %15 = tpu.matmul %13, %14, %cst_15 {dimension_numbers = #tpu.dot_dimension_numbers<[1], [0], [0], [1], [0, 0, 1, 1], [], []>} : vector<2x32xf32>, vector<32x32xf32>, vector<2x32xf32> -> vector<2x32xf32>
    %c0_16 = arith.constant 0 : index
    %c0_17 = arith.constant 0 : index
    %16 = vector.load %arg9[%c0_16, %c0_17] : memref<1x32xf32, #tpu.memory_space<vmem>>, vector<1x32xf32>
    %17 = vector.broadcast %16 : vector<1x32xf32> to vector<2x32xf32>
    %18 = arith.addf %15, %17 : vector<2x32xf32>
    %c0_18 = arith.constant 0 : index
    %c0_19 = arith.constant 0 : index
    %19 = vector.load %arg10[%c0_18, %c0_19] : memref<32x128xf32, #tpu.memory_space<vmem>>, vector<32x128xf32>
    %cst_20 = arith.constant dense<0.000000e+00> : vector<2x128xf32>
    %20 = tpu.matmul %18, %19, %cst_20 {dimension_numbers = #tpu.dot_dimension_numbers<[1], [0], [0], [1], [0, 0, 1, 1], [], []>} : vector<2x32xf32>, vector<32x128xf32>, vector<2x128xf32> -> vector<2x128xf32>
    %c0_21 = arith.constant 0 : index
    %c0_22 = arith.constant 0 : index
    %21 = vector.load %arg12[%c0_21, %c0_22] : memref<1x128xf32, #tpu.memory_space<vmem>>, vector<1x128xf32>
    %22 = vector.broadcast %21 : vector<1x128xf32> to vector<2x128xf32>
    %23 = arith.addf %20, %22 : vector<2x128xf32>
    %c0_23 = arith.constant 0 : index
    %c0_24 = arith.constant 0 : index
    %24 = vector.load %arg6[%c0_23, %c0_24] : memref<16x32xf32, #tpu.memory_space<vmem>>, vector<16x32xf32>
    %c0_25 = arith.constant 0 : index
    %c0_26 = arith.constant 0 : index
    %25 = vector.load %arg8[%c0_25, %c0_26] : memref<32x32xf32, #tpu.memory_space<vmem>>, vector<32x32xf32>
    %cst_27 = arith.constant dense<0.000000e+00> : vector<16x32xf32>
    %26 = tpu.matmul %24, %25, %cst_27 {dimension_numbers = #tpu.dot_dimension_numbers<[1], [0], [0], [1], [0, 0, 1, 1], [], []>} : vector<16x32xf32>, vector<32x32xf32>, vector<16x32xf32> -> vector<16x32xf32>
    %c0_28 = arith.constant 0 : index
    %c0_29 = arith.constant 0 : index
    %27 = vector.load %arg10[%c0_28, %c0_29] : memref<32x128xf32, #tpu.memory_space<vmem>>, vector<32x128xf32>
    %cst_30 = arith.constant dense<0.000000e+00> : vector<16x128xf32>
    %28 = tpu.matmul %26, %27, %cst_30 {dimension_numbers = #tpu.dot_dimension_numbers<[1], [0], [0], [1], [0, 0, 1, 1], [], []>} : vector<16x32xf32>, vector<32x128xf32>, vector<16x128xf32> -> vector<16x128xf32>
    %c0_31 = arith.constant 0 : index
    %c0_32 = arith.constant 0 : index
    %29 = vector.load %arg11[%c0_31, %c0_32] : memref<32x128xf32, #tpu.memory_space<vmem>>, vector<32x128xf32>
    %cst_33 = arith.constant 0.000000e+00 : f32
    %30 = vector.broadcast %cst_33 : f32 to vector<2x32xf32>
    %cst_34 = arith.constant 0.000000e+00 : f32
    %31 = vector.broadcast %cst_34 : f32 to vector<2x32xf32>
    %32 = vector.extract_strided_slice %28 {offsets = [0, 0], sizes = [2, 128], strides = [1, 1]} : vector<16x128xf32> to vector<2x128xf32>
    %33 = arith.addf %32, %23 : vector<2x128xf32>
    %cst_35 = arith.constant dense<0.000000e+00> : vector<2x128xf32>
    %34 = tpu.matmul %30, %29, %cst_35 {dimension_numbers = #tpu.dot_dimension_numbers<[1], [0], [0], [1], [0, 0, 1, 1], [], []>} : vector<2x32xf32>, vector<32x128xf32>, vector<2x128xf32> -> vector<2x128xf32>
    %35 = arith.addf %33, %34 : vector<2x128xf32>
    %36 = vector.extract_strided_slice %35 {offsets = [0, 0], sizes = [2, 32], strides = [1, 1]} : vector<2x128xf32> to vector<2x32xf32>
    %37 = arith.negf %36 : vector<2x32xf32>
    %38 = math.exp %37 : vector<2x32xf32>
    %cst_36 = arith.constant 1.000000e+00 : f32
    %39 = vector.broadcast %cst_36 : f32 to vector<2x32xf32>
    %40 = arith.addf %39, %38 : vector<2x32xf32>
    %41 = arith.divf %39, %40 : vector<2x32xf32>
    %42 = vector.extract_strided_slice %35 {offsets = [0, 32], sizes = [2, 32], strides = [1, 1]} : vector<2x128xf32> to vector<2x32xf32>
    %43 = arith.negf %42 : vector<2x32xf32>
    %44 = math.exp %43 : vector<2x32xf32>
    %cst_37 = arith.constant 1.000000e+00 : f32
    %45 = vector.broadcast %cst_37 : f32 to vector<2x32xf32>
    %46 = arith.addf %45, %44 : vector<2x32xf32>
    %47 = arith.divf %45, %46 : vector<2x32xf32>
    %48 = vector.extract_strided_slice %35 {offsets = [0, 64], sizes = [2, 32], strides = [1, 1]} : vector<2x128xf32> to vector<2x32xf32>
    %49 = math.tanh %48 : vector<2x32xf32>
    %50 = vector.extract_strided_slice %35 {offsets = [0, 96], sizes = [2, 32], strides = [1, 1]} : vector<2x128xf32> to vector<2x32xf32>
    %51 = arith.negf %50 : vector<2x32xf32>
    %52 = math.exp %51 : vector<2x32xf32>
    %cst_38 = arith.constant 1.000000e+00 : f32
    %53 = vector.broadcast %cst_38 : f32 to vector<2x32xf32>
    %54 = arith.addf %53, %52 : vector<2x32xf32>
    %55 = arith.divf %53, %54 : vector<2x32xf32>
    %56 = arith.mulf %47, %31 : vector<2x32xf32>
    %57 = arith.mulf %41, %49 : vector<2x32xf32>
    %58 = arith.addf %56, %57 : vector<2x32xf32>
    %59 = math.tanh %58 : vector<2x32xf32>
    %60 = arith.mulf %55, %59 : vector<2x32xf32>
    %61 = vector.extract_strided_slice %28 {offsets = [2, 0], sizes = [2, 128], strides = [1, 1]} : vector<16x128xf32> to vector<2x128xf32>
    %62 = arith.addf %61, %23 : vector<2x128xf32>
    %cst_39 = arith.constant dense<0.000000e+00> : vector<2x128xf32>
    %63 = tpu.matmul %60, %29, %cst_39 {dimension_numbers = #tpu.dot_dimension_numbers<[1], [0], [0], [1], [0, 0, 1, 1], [], []>} : vector<2x32xf32>, vector<32x128xf32>, vector<2x128xf32> -> vector<2x128xf32>
    %64 = arith.addf %62, %63 : vector<2x128xf32>
    %65 = vector.extract_strided_slice %64 {offsets = [0, 0], sizes = [2, 32], strides = [1, 1]} : vector<2x128xf32> to vector<2x32xf32>
    %66 = arith.negf %65 : vector<2x32xf32>
    %67 = math.exp %66 : vector<2x32xf32>
    %cst_40 = arith.constant 1.000000e+00 : f32
    %68 = vector.broadcast %cst_40 : f32 to vector<2x32xf32>
    %69 = arith.addf %68, %67 : vector<2x32xf32>
    %70 = arith.divf %68, %69 : vector<2x32xf32>
    %71 = vector.extract_strided_slice %64 {offsets = [0, 32], sizes = [2, 32], strides = [1, 1]} : vector<2x128xf32> to vector<2x32xf32>
    %72 = arith.negf %71 : vector<2x32xf32>
    %73 = math.exp %72 : vector<2x32xf32>
    %cst_41 = arith.constant 1.000000e+00 : f32
    %74 = vector.broadcast %cst_41 : f32 to vector<2x32xf32>
    %75 = arith.addf %74, %73 : vector<2x32xf32>
    %76 = arith.divf %74, %75 : vector<2x32xf32>
    %77 = vector.extract_strided_slice %64 {offsets = [0, 64], sizes = [2, 32], strides = [1, 1]} : vector<2x128xf32> to vector<2x32xf32>
    %78 = math.tanh %77 : vector<2x32xf32>
    %79 = vector.extract_strided_slice %64 {offsets = [0, 96], sizes = [2, 32], strides = [1, 1]} : vector<2x128xf32> to vector<2x32xf32>
    %80 = arith.negf %79 : vector<2x32xf32>
    %81 = math.exp %80 : vector<2x32xf32>
    %cst_42 = arith.constant 1.000000e+00 : f32
    %82 = vector.broadcast %cst_42 : f32 to vector<2x32xf32>
    %83 = arith.addf %82, %81 : vector<2x32xf32>
    %84 = arith.divf %82, %83 : vector<2x32xf32>
    %85 = arith.mulf %76, %58 : vector<2x32xf32>
    %86 = arith.mulf %70, %78 : vector<2x32xf32>
    %87 = arith.addf %85, %86 : vector<2x32xf32>
    %88 = math.tanh %87 : vector<2x32xf32>
    %89 = arith.mulf %84, %88 : vector<2x32xf32>
    %90 = vector.extract_strided_slice %28 {offsets = [4, 0], sizes = [2, 128], strides = [1, 1]} : vector<16x128xf32> to vector<2x128xf32>
    %91 = arith.addf %90, %23 : vector<2x128xf32>
    %cst_43 = arith.constant dense<0.000000e+00> : vector<2x128xf32>
    %92 = tpu.matmul %89, %29, %cst_43 {dimension_numbers = #tpu.dot_dimension_numbers<[1], [0], [0], [1], [0, 0, 1, 1], [], []>} : vector<2x32xf32>, vector<32x128xf32>, vector<2x128xf32> -> vector<2x128xf32>
    %93 = arith.addf %91, %92 : vector<2x128xf32>
    %94 = vector.extract_strided_slice %93 {offsets = [0, 0], sizes = [2, 32], strides = [1, 1]} : vector<2x128xf32> to vector<2x32xf32>
    %95 = arith.negf %94 : vector<2x32xf32>
    %96 = math.exp %95 : vector<2x32xf32>
    %cst_44 = arith.constant 1.000000e+00 : f32
    %97 = vector.broadcast %cst_44 : f32 to vector<2x32xf32>
    %98 = arith.addf %97, %96 : vector<2x32xf32>
    %99 = arith.divf %97, %98 : vector<2x32xf32>
    %100 = vector.extract_strided_slice %93 {offsets = [0, 32], sizes = [2, 32], strides = [1, 1]} : vector<2x128xf32> to vector<2x32xf32>
    %101 = arith.negf %100 : vector<2x32xf32>
    %102 = math.exp %101 : vector<2x32xf32>
    %cst_45 = arith.constant 1.000000e+00 : f32
    %103 = vector.broadcast %cst_45 : f32 to vector<2x32xf32>
    %104 = arith.addf %103, %102 : vector<2x32xf32>
    %105 = arith.divf %103, %104 : vector<2x32xf32>
    %106 = vector.extract_strided_slice %93 {offsets = [0, 64], sizes = [2, 32], strides = [1, 1]} : vector<2x128xf32> to vector<2x32xf32>
    %107 = math.tanh %106 : vector<2x32xf32>
    %108 = vector.extract_strided_slice %93 {offsets = [0, 96], sizes = [2, 32], strides = [1, 1]} : vector<2x128xf32> to vector<2x32xf32>
    %109 = arith.negf %108 : vector<2x32xf32>
    %110 = math.exp %109 : vector<2x32xf32>
    %cst_46 = arith.constant 1.000000e+00 : f32
    %111 = vector.broadcast %cst_46 : f32 to vector<2x32xf32>
    %112 = arith.addf %111, %110 : vector<2x32xf32>
    %113 = arith.divf %111, %112 : vector<2x32xf32>
    %114 = arith.mulf %105, %87 : vector<2x32xf32>
    %115 = arith.mulf %99, %107 : vector<2x32xf32>
    %116 = arith.addf %114, %115 : vector<2x32xf32>
    %117 = math.tanh %116 : vector<2x32xf32>
    %118 = arith.mulf %113, %117 : vector<2x32xf32>
    %119 = vector.extract_strided_slice %28 {offsets = [6, 0], sizes = [2, 128], strides = [1, 1]} : vector<16x128xf32> to vector<2x128xf32>
    %120 = arith.addf %119, %23 : vector<2x128xf32>
    %cst_47 = arith.constant dense<0.000000e+00> : vector<2x128xf32>
    %121 = tpu.matmul %118, %29, %cst_47 {dimension_numbers = #tpu.dot_dimension_numbers<[1], [0], [0], [1], [0, 0, 1, 1], [], []>} : vector<2x32xf32>, vector<32x128xf32>, vector<2x128xf32> -> vector<2x128xf32>
    %122 = arith.addf %120, %121 : vector<2x128xf32>
    %123 = vector.extract_strided_slice %122 {offsets = [0, 0], sizes = [2, 32], strides = [1, 1]} : vector<2x128xf32> to vector<2x32xf32>
    %124 = arith.negf %123 : vector<2x32xf32>
    %125 = math.exp %124 : vector<2x32xf32>
    %cst_48 = arith.constant 1.000000e+00 : f32
    %126 = vector.broadcast %cst_48 : f32 to vector<2x32xf32>
    %127 = arith.addf %126, %125 : vector<2x32xf32>
    %128 = arith.divf %126, %127 : vector<2x32xf32>
    %129 = vector.extract_strided_slice %122 {offsets = [0, 32], sizes = [2, 32], strides = [1, 1]} : vector<2x128xf32> to vector<2x32xf32>
    %130 = arith.negf %129 : vector<2x32xf32>
    %131 = math.exp %130 : vector<2x32xf32>
    %cst_49 = arith.constant 1.000000e+00 : f32
    %132 = vector.broadcast %cst_49 : f32 to vector<2x32xf32>
    %133 = arith.addf %132, %131 : vector<2x32xf32>
    %134 = arith.divf %132, %133 : vector<2x32xf32>
    %135 = vector.extract_strided_slice %122 {offsets = [0, 64], sizes = [2, 32], strides = [1, 1]} : vector<2x128xf32> to vector<2x32xf32>
    %136 = math.tanh %135 : vector<2x32xf32>
    %137 = vector.extract_strided_slice %122 {offsets = [0, 96], sizes = [2, 32], strides = [1, 1]} : vector<2x128xf32> to vector<2x32xf32>
    %138 = arith.negf %137 : vector<2x32xf32>
    %139 = math.exp %138 : vector<2x32xf32>
    %cst_50 = arith.constant 1.000000e+00 : f32
    %140 = vector.broadcast %cst_50 : f32 to vector<2x32xf32>
    %141 = arith.addf %140, %139 : vector<2x32xf32>
    %142 = arith.divf %140, %141 : vector<2x32xf32>
    %143 = arith.mulf %134, %116 : vector<2x32xf32>
    %144 = arith.mulf %128, %136 : vector<2x32xf32>
    %145 = arith.addf %143, %144 : vector<2x32xf32>
    %146 = math.tanh %145 : vector<2x32xf32>
    %147 = arith.mulf %142, %146 : vector<2x32xf32>
    %148 = vector.extract_strided_slice %28 {offsets = [8, 0], sizes = [2, 128], strides = [1, 1]} : vector<16x128xf32> to vector<2x128xf32>
    %149 = arith.addf %148, %23 : vector<2x128xf32>
    %cst_51 = arith.constant dense<0.000000e+00> : vector<2x128xf32>
    %150 = tpu.matmul %147, %29, %cst_51 {dimension_numbers = #tpu.dot_dimension_numbers<[1], [0], [0], [1], [0, 0, 1, 1], [], []>} : vector<2x32xf32>, vector<32x128xf32>, vector<2x128xf32> -> vector<2x128xf32>
    %151 = arith.addf %149, %150 : vector<2x128xf32>
    %152 = vector.extract_strided_slice %151 {offsets = [0, 0], sizes = [2, 32], strides = [1, 1]} : vector<2x128xf32> to vector<2x32xf32>
    %153 = arith.negf %152 : vector<2x32xf32>
    %154 = math.exp %153 : vector<2x32xf32>
    %cst_52 = arith.constant 1.000000e+00 : f32
    %155 = vector.broadcast %cst_52 : f32 to vector<2x32xf32>
    %156 = arith.addf %155, %154 : vector<2x32xf32>
    %157 = arith.divf %155, %156 : vector<2x32xf32>
    %158 = vector.extract_strided_slice %151 {offsets = [0, 32], sizes = [2, 32], strides = [1, 1]} : vector<2x128xf32> to vector<2x32xf32>
    %159 = arith.negf %158 : vector<2x32xf32>
    %160 = math.exp %159 : vector<2x32xf32>
    %cst_53 = arith.constant 1.000000e+00 : f32
    %161 = vector.broadcast %cst_53 : f32 to vector<2x32xf32>
    %162 = arith.addf %161, %160 : vector<2x32xf32>
    %163 = arith.divf %161, %162 : vector<2x32xf32>
    %164 = vector.extract_strided_slice %151 {offsets = [0, 64], sizes = [2, 32], strides = [1, 1]} : vector<2x128xf32> to vector<2x32xf32>
    %165 = math.tanh %164 : vector<2x32xf32>
    %166 = vector.extract_strided_slice %151 {offsets = [0, 96], sizes = [2, 32], strides = [1, 1]} : vector<2x128xf32> to vector<2x32xf32>
    %167 = arith.negf %166 : vector<2x32xf32>
    %168 = math.exp %167 : vector<2x32xf32>
    %cst_54 = arith.constant 1.000000e+00 : f32
    %169 = vector.broadcast %cst_54 : f32 to vector<2x32xf32>
    %170 = arith.addf %169, %168 : vector<2x32xf32>
    %171 = arith.divf %169, %170 : vector<2x32xf32>
    %172 = arith.mulf %163, %145 : vector<2x32xf32>
    %173 = arith.mulf %157, %165 : vector<2x32xf32>
    %174 = arith.addf %172, %173 : vector<2x32xf32>
    %175 = math.tanh %174 : vector<2x32xf32>
    %176 = arith.mulf %171, %175 : vector<2x32xf32>
    %177 = vector.extract_strided_slice %28 {offsets = [10, 0], sizes = [2, 128], strides = [1, 1]} : vector<16x128xf32> to vector<2x128xf32>
    %178 = arith.addf %177, %23 : vector<2x128xf32>
    %cst_55 = arith.constant dense<0.000000e+00> : vector<2x128xf32>
    %179 = tpu.matmul %176, %29, %cst_55 {dimension_numbers = #tpu.dot_dimension_numbers<[1], [0], [0], [1], [0, 0, 1, 1], [], []>} : vector<2x32xf32>, vector<32x128xf32>, vector<2x128xf32> -> vector<2x128xf32>
    %180 = arith.addf %178, %179 : vector<2x128xf32>
    %181 = vector.extract_strided_slice %180 {offsets = [0, 0], sizes = [2, 32], strides = [1, 1]} : vector<2x128xf32> to vector<2x32xf32>
    %182 = arith.negf %181 : vector<2x32xf32>
    %183 = math.exp %182 : vector<2x32xf32>
    %cst_56 = arith.constant 1.000000e+00 : f32
    %184 = vector.broadcast %cst_56 : f32 to vector<2x32xf32>
    %185 = arith.addf %184, %183 : vector<2x32xf32>
    %186 = arith.divf %184, %185 : vector<2x32xf32>
    %187 = vector.extract_strided_slice %180 {offsets = [0, 32], sizes = [2, 32], strides = [1, 1]} : vector<2x128xf32> to vector<2x32xf32>
    %188 = arith.negf %187 : vector<2x32xf32>
    %189 = math.exp %188 : vector<2x32xf32>
    %cst_57 = arith.constant 1.000000e+00 : f32
    %190 = vector.broadcast %cst_57 : f32 to vector<2x32xf32>
    %191 = arith.addf %190, %189 : vector<2x32xf32>
    %192 = arith.divf %190, %191 : vector<2x32xf32>
    %193 = vector.extract_strided_slice %180 {offsets = [0, 64], sizes = [2, 32], strides = [1, 1]} : vector<2x128xf32> to vector<2x32xf32>
    %194 = math.tanh %193 : vector<2x32xf32>
    %195 = vector.extract_strided_slice %180 {offsets = [0, 96], sizes = [2, 32], strides = [1, 1]} : vector<2x128xf32> to vector<2x32xf32>
    %196 = arith.negf %195 : vector<2x32xf32>
    %197 = math.exp %196 : vector<2x32xf32>
    %cst_58 = arith.constant 1.000000e+00 : f32
    %198 = vector.broadcast %cst_58 : f32 to vector<2x32xf32>
    %199 = arith.addf %198, %197 : vector<2x32xf32>
    %200 = arith.divf %198, %199 : vector<2x32xf32>
    %201 = arith.mulf %192, %174 : vector<2x32xf32>
    %202 = arith.mulf %186, %194 : vector<2x32xf32>
    %203 = arith.addf %201, %202 : vector<2x32xf32>
    %204 = math.tanh %203 : vector<2x32xf32>
    %205 = arith.mulf %200, %204 : vector<2x32xf32>
    %206 = vector.extract_strided_slice %28 {offsets = [12, 0], sizes = [2, 128], strides = [1, 1]} : vector<16x128xf32> to vector<2x128xf32>
    %207 = arith.addf %206, %23 : vector<2x128xf32>
    %cst_59 = arith.constant dense<0.000000e+00> : vector<2x128xf32>
    %208 = tpu.matmul %205, %29, %cst_59 {dimension_numbers = #tpu.dot_dimension_numbers<[1], [0], [0], [1], [0, 0, 1, 1], [], []>} : vector<2x32xf32>, vector<32x128xf32>, vector<2x128xf32> -> vector<2x128xf32>
    %209 = arith.addf %207, %208 : vector<2x128xf32>
    %210 = vector.extract_strided_slice %209 {offsets = [0, 0], sizes = [2, 32], strides = [1, 1]} : vector<2x128xf32> to vector<2x32xf32>
    %211 = arith.negf %210 : vector<2x32xf32>
    %212 = math.exp %211 : vector<2x32xf32>
    %cst_60 = arith.constant 1.000000e+00 : f32
    %213 = vector.broadcast %cst_60 : f32 to vector<2x32xf32>
    %214 = arith.addf %213, %212 : vector<2x32xf32>
    %215 = arith.divf %213, %214 : vector<2x32xf32>
    %216 = vector.extract_strided_slice %209 {offsets = [0, 32], sizes = [2, 32], strides = [1, 1]} : vector<2x128xf32> to vector<2x32xf32>
    %217 = arith.negf %216 : vector<2x32xf32>
    %218 = math.exp %217 : vector<2x32xf32>
    %cst_61 = arith.constant 1.000000e+00 : f32
    %219 = vector.broadcast %cst_61 : f32 to vector<2x32xf32>
    %220 = arith.addf %219, %218 : vector<2x32xf32>
    %221 = arith.divf %219, %220 : vector<2x32xf32>
    %222 = vector.extract_strided_slice %209 {offsets = [0, 64], sizes = [2, 32], strides = [1, 1]} : vector<2x128xf32> to vector<2x32xf32>
    %223 = math.tanh %222 : vector<2x32xf32>
    %224 = vector.extract_strided_slice %209 {offsets = [0, 96], sizes = [2, 32], strides = [1, 1]} : vector<2x128xf32> to vector<2x32xf32>
    %225 = arith.negf %224 : vector<2x32xf32>
    %226 = math.exp %225 : vector<2x32xf32>
    %cst_62 = arith.constant 1.000000e+00 : f32
    %227 = vector.broadcast %cst_62 : f32 to vector<2x32xf32>
    %228 = arith.addf %227, %226 : vector<2x32xf32>
    %229 = arith.divf %227, %228 : vector<2x32xf32>
    %230 = arith.mulf %221, %203 : vector<2x32xf32>
    %231 = arith.mulf %215, %223 : vector<2x32xf32>
    %232 = arith.addf %230, %231 : vector<2x32xf32>
    %233 = math.tanh %232 : vector<2x32xf32>
    %234 = arith.mulf %229, %233 : vector<2x32xf32>
    %235 = vector.extract_strided_slice %28 {offsets = [14, 0], sizes = [2, 128], strides = [1, 1]} : vector<16x128xf32> to vector<2x128xf32>
    %236 = arith.addf %235, %23 : vector<2x128xf32>
    %cst_63 = arith.constant dense<0.000000e+00> : vector<2x128xf32>
    %237 = tpu.matmul %234, %29, %cst_63 {dimension_numbers = #tpu.dot_dimension_numbers<[1], [0], [0], [1], [0, 0, 1, 1], [], []>} : vector<2x32xf32>, vector<32x128xf32>, vector<2x128xf32> -> vector<2x128xf32>
    %238 = arith.addf %236, %237 : vector<2x128xf32>
    %239 = vector.extract_strided_slice %238 {offsets = [0, 0], sizes = [2, 32], strides = [1, 1]} : vector<2x128xf32> to vector<2x32xf32>
    %240 = arith.negf %239 : vector<2x32xf32>
    %241 = math.exp %240 : vector<2x32xf32>
    %cst_64 = arith.constant 1.000000e+00 : f32
    %242 = vector.broadcast %cst_64 : f32 to vector<2x32xf32>
    %243 = arith.addf %242, %241 : vector<2x32xf32>
    %244 = arith.divf %242, %243 : vector<2x32xf32>
    %245 = vector.extract_strided_slice %238 {offsets = [0, 32], sizes = [2, 32], strides = [1, 1]} : vector<2x128xf32> to vector<2x32xf32>
    %246 = arith.negf %245 : vector<2x32xf32>
    %247 = math.exp %246 : vector<2x32xf32>
    %cst_65 = arith.constant 1.000000e+00 : f32
    %248 = vector.broadcast %cst_65 : f32 to vector<2x32xf32>
    %249 = arith.addf %248, %247 : vector<2x32xf32>
    %250 = arith.divf %248, %249 : vector<2x32xf32>
    %251 = vector.extract_strided_slice %238 {offsets = [0, 64], sizes = [2, 32], strides = [1, 1]} : vector<2x128xf32> to vector<2x32xf32>
    %252 = math.tanh %251 : vector<2x32xf32>
    %253 = vector.extract_strided_slice %238 {offsets = [0, 96], sizes = [2, 32], strides = [1, 1]} : vector<2x128xf32> to vector<2x32xf32>
    %254 = arith.negf %253 : vector<2x32xf32>
    %255 = math.exp %254 : vector<2x32xf32>
    %cst_66 = arith.constant 1.000000e+00 : f32
    %256 = vector.broadcast %cst_66 : f32 to vector<2x32xf32>
    %257 = arith.addf %256, %255 : vector<2x32xf32>
    %258 = arith.divf %256, %257 : vector<2x32xf32>
    %259 = arith.mulf %250, %232 : vector<2x32xf32>
    %260 = arith.mulf %244, %252 : vector<2x32xf32>
    %261 = arith.addf %259, %260 : vector<2x32xf32>
    %262 = math.tanh %261 : vector<2x32xf32>
    %263 = arith.mulf %258, %262 : vector<2x32xf32>
    %264 = tpu.concatenate %60, %89, %118, %147, %176, %205, %234, %263 in 0 : vector<2x32xf32>, vector<2x32xf32>, vector<2x32xf32>, vector<2x32xf32>, vector<2x32xf32>, vector<2x32xf32>, vector<2x32xf32>, vector<2x32xf32> -> vector<16x32xf32>
    %c0_67 = arith.constant 0 : index
    %c0_68 = arith.constant 0 : index
    %265 = vector.load %arg13[%c0_67, %c0_68] : memref<32x128xf32, #tpu.memory_space<vmem>>, vector<32x128xf32>
    %cst_69 = arith.constant dense<0.000000e+00> : vector<16x128xf32>
    %266 = tpu.matmul %264, %265, %cst_69 {dimension_numbers = #tpu.dot_dimension_numbers<[1], [0], [0], [1], [0, 0, 1, 1], [], []>} : vector<16x32xf32>, vector<32x128xf32>, vector<16x128xf32> -> vector<16x128xf32>
    %c0_70 = arith.constant 0 : index
    %c0_71 = arith.constant 0 : index
    %267 = vector.load %arg14[%c0_70, %c0_71] : memref<1x128xf32, #tpu.memory_space<vmem>>, vector<1x128xf32>
    %268 = vector.broadcast %267 : vector<1x128xf32> to vector<16x128xf32>
    %269 = arith.addf %266, %268 : vector<16x128xf32>
    %c0_72 = arith.constant 0 : index
    %c0_73 = arith.constant 0 : index
    %270 = vector.load %arg15[%c0_72, %c0_73] : memref<16x128xf32, #tpu.memory_space<vmem>>, vector<16x128xf32>
    tpu.vector_store %arg15[%c0_72, %c0_73], %269 {strides = array<i32>} : memref<16x128xf32, #tpu.memory_space<vmem>>, vector<16x128xf32>,
    return
  }
  func.func @transform_0(%arg0: i32) -> (i32, i32, i32) {
    %c0_i32 = arith.constant 0 : i32
    %c0_i32_0 = arith.constant 0 : i32
    %c0_i32_1 = arith.constant 0 : i32
    %c0_i32_2 = arith.constant 0 : i32
    return %c0_i32, %c0_i32_0, %c0_i32_1 : i32, i32, i32
  }
  func.func @transform_1(%arg0: i32) -> (i32, i32) {
    %c0_i32 = arith.constant 0 : i32
    %c0_i32_0 = arith.constant 0 : i32
    %c0_i32_1 = arith.constant 0 : i32
    return %c0_i32, %c0_i32_0 : i32, i32
  }
  func.func @transform_2(%arg0: i32) -> (i32, i32) {
    %c0_i32 = arith.constant 0 : i32
    %c0_i32_0 = arith.constant 0 : i32
    %c0_i32_1 = arith.constant 0 : i32
    return %c0_i32, %c0_i32_0 : i32, i32
  }
  func.func @transform_3(%arg0: i32) -> (i32, i32) {
    %c0_i32 = arith.constant 0 : i32
    %c0_i32_0 = arith.constant 0 : i32
    %c0_i32_1 = arith.constant 0 : i32
    return %c0_i32, %c0_i32_0 : i32, i32
  }
  func.func @transform_4(%arg0: i32) -> (i32, i32) {
    %c0_i32 = arith.constant 0 : i32
    %c0_i32_0 = arith.constant 0 : i32
    %c0_i32_1 = arith.constant 0 : i32
    return %c0_i32, %c0_i32_0 : i32, i32
  }
  func.func @transform_5(%arg0: i32) -> (i32, i32) {
    %c0_i32 = arith.constant 0 : i32
    %c0_i32_0 = arith.constant 0 : i32
    %c0_i32_1 = arith.constant 0 : i32
    return %c0_i32, %c0_i32_0 : i32, i32
  }
  func.func @transform_6(%arg0: i32) -> (i32, i32) {
    %c0_i32 = arith.constant 0 : i32
    %c0_i32_0 = arith.constant 0 : i32
    %c0_i32_1 = arith.constant 0 : i32
    return %c0_i32, %c0_i32_0 : i32, i32
  }
  func.func @transform_7(%arg0: i32) -> (i32, i32) {
    %c0_i32 = arith.constant 0 : i32
    %c0_i32_0 = arith.constant 0 : i32
    %c0_i32_1 = arith.constant 0 : i32
    return %c0_i32, %c0_i32_0 : i32, i32
  }
  func.func @transform_8(%arg0: i32) -> (i32, i32) {
    %c0_i32 = arith.constant 0 : i32
    %c0_i32_0 = arith.constant 0 : i32
    %c0_i32_1 = arith.constant 0 : i32
    return %c0_i32, %c0_i32_0 : i32, i32
  }
  func.func @transform_9(%arg0: i32) -> (i32, i32) {
    %c0_i32 = arith.constant 0 : i32
    %c0_i32_0 = arith.constant 0 : i32
    %c0_i32_1 = arith.constant 0 : i32
    return %c0_i32, %c0_i32_0 : i32, i32
  }
  func.func @transform_10(%arg0: i32) -> (i32, i32) {
    %c0_i32 = arith.constant 0 : i32
    %c0_i32_0 = arith.constant 0 : i32
    %c0_i32_1 = arith.constant 0 : i32
    return %c0_i32, %c0_i32_0 : i32, i32
  }
  func.func @transform_11(%arg0: i32) -> (i32, i32) {
    %c0_i32 = arith.constant 0 : i32
    %c0_i32_0 = arith.constant 0 : i32
    %c0_i32_1 = arith.constant 0 : i32
    return %c0_i32, %c0_i32_0 : i32, i32
  }
  func.func @transform_12(%arg0: i32) -> (i32, i32) {
    %c0_i32 = arith.constant 0 : i32
    %c0_i32_0 = arith.constant 0 : i32
    %c0_i32_1 = arith.constant 0 : i32
    return %c0_i32, %c0_i32_0 : i32, i32
  }
  func.func @transform_13(%arg0: i32) -> (i32, i32) {
    %c0_i32 = arith.constant 0 : i32
    %c0_i32_0 = arith.constant 0 : i32
    %c0_i32_1 = arith.constant 0 : i32
    return %c0_i32, %c0_i32_0 : i32, i32
  }
  func.func @transform_14(%arg0: i32) -> (i32, i32) {
    %c0_i32 = arith.constant 0 : i32
    %c0_i32_0 = arith.constant 0 : i32
    %c0_i32_1 = arith.constant 0 : i32
    return %c0_i32, %c0_i32_0 : i32, i32
  }
}

</mosaic_0001>

<bundles_post_ra>
// kernel: tpu_custom_call.1
= control target key start
LH: loop header
LB: loop body
LE: loop exit
PB: predicated region body
PF: predicated region fallthrough
CT: control target
= control target key end

     0   :  { %s1772_s0 = inlined_call_operand.vmem [shape: f32[2,3,256], index: 0, kind: input, shape index: {}]   ;;  %s1773_s1 = inlined_call_operand.vmem [shape: f32[3,512], index: 1, kind: input, shape index: {}]   ;;  %s1774_s2 = inlined_call_operand.vmem [shape: f32[1,512], index: 2, kind: input, shape index: {}]   ;;  %s1775_s3 = inlined_call_operand.vmem [shape: f32[512,32], index: 3, kind: input, shape index: {}]   ;;  %s1776_s4 = inlined_call_operand.vmem [shape: f32[1,32], index: 4, kind: input, shape index: {}]   ;;  %s1777_s5 = inlined_call_operand.vmem [shape: f32[16,32], index: 5, kind: input, shape index: {}]   ;;  %s1778_s6 = inlined_call_operand.vmem [shape: f32[32,32], index: 6, kind: input, shape index: {}]   ;;  %s1779_s7 = inlined_call_operand.vmem [shape: f32[32,32], index: 7, kind: input, shape index: {}]   ;;  %s1780_s8 = inlined_call_operand.vmem [shape: f32[1,32], index: 8, kind: input, shape index: {}]   ;;  %s1781_s9 = inlined_call_operand.vmem [shape: f32[32,128], index: 9, kind: input, shape index: {}]   ;;  %s1782_s10 = inlined_call_operand.vmem [shape: f32[32,128], index: 10, kind: input, shape index: {}]   ;;  %s1783_s11 = inlined_call_operand.vmem [shape: f32[1,128], index: 11, kind: input, shape index: {}]   ;;  %s1784_s12 = inlined_call_operand.vmem [shape: f32[32,128], index: 12, kind: input, shape index: {}]   ;;  %s1785_s13 = inlined_call_operand.vmem [shape: f32[1,128], index: 13, kind: input, shape index: {}]   ;;  %s1786_s14 = inlined_call_operand.hbm [shape: f32[16,128], index: 14, kind: output, shape index: {}]  }
   0x1   :  { %v48_v0 = vld [vmem:[%s1772_s0] sm:$0x77]  ;;  %v49_v1 = vld [vmem:[%s1772_s0 + $0x8] sm:$0x77] }
   0x2   :  { %52 = vst [vmem:[#allocation1] ss:$2 sm:$0xff] %v48_v0 }
   0x3   :  { %56 = vst [vmem:[#allocation1 + $0x10] ss:$2 sm:$0xff] %v49_v1 }
   0x4   :  { %19 = vsyncpa [#allocation3], 0  ;;  %vm63_vm0 = vcmask 1042432   ;;  %v83_v2 = vld [vmem:[%s1773_s1] sm:$0x77]  ;;  %v1251_v14 = vmov 256.0  }
   0x5   :  { %v84_v3 = vld [vmem:[%s1773_s1 + $0x8] sm:$0x77]  ;;  %1159 = vrcp.f32 %v1251_v14  ;;  %v218_v19 = vld [vmem:[%s1775_s3 + $0x78] sm:$0xff]  ;;  %v217_v21 = vld [vmem:[%s1775_s3 + $0x70] sm:$0xff]  ;;  %vm101_vm2 = vcmask 1041409   ;;  %vm112_vm3 = vcmask 23552  }
   0x6   :  { %v234_v20 = vld [vmem:[%s1775_s3 + $0xf8] sm:$0xff]  ;;  %v233_v22 = vld [vmem:[%s1775_s3 + $0xf0] sm:$0xff]  ;;  %v216_v24 = vld [vmem:[%s1775_s3 + $0x68] sm:$0xff]  ;;  %vm359_vm4 = vcmask 261120   ;;  %s1255_s26 = smov [#allocation2]   ;;  %s1101_s28 = sshll.u32 %s1786_s14, 4  ;;  %s1102_s28 = int_to_ptr.hbm [resolvable:$true] %s1101_s28 }
   0x7   :  { %v232_v25 = vld [vmem:[%s1775_s3 + $0xe8] sm:$0xff]  ;;  %v250_v26 = vld [vmem:[%s1775_s3 + $0x178] sm:$0xff]  ;;  %v215_v27 = vld [vmem:[%s1775_s3 + $0x60] sm:$0xff]  ;;  %s1257_s29 = smov 8  }
   0x8   :  { %v266_v28 = vld [vmem:[%s1775_s3 + $0x1f8] sm:$0xff]  ;;  %v231_v29 = vld [vmem:[%s1775_s3 + $0xe0] sm:$0xff]  ;;  %v249_v30 = vld [vmem:[%s1775_s3 + $0x170] sm:$0xff] }
   0x9   :  { %v53_v4 = vld.sshfl [vmem:[#allocation1] sm:$0xff pattern:$0x75316420]  ;;  %v54_v5 = vld.sshfl [vmem:[#allocation1 + $0x8] sm:$0xff pattern:$0x75316420] }
   0xa   :  { %v64_v6 = vsel %vm63_vm0, %v53_v4, 0.0  ;;  %v65_v7 = vsel %vm63_vm0, %v54_v5, 0.0  ;;  %105 = vst [vmem:[#allocation1] ss:$2 sm:$0xff] %v83_v2  ;;  %v265_v31 = vld [vmem:[%s1775_s3 + $0x1f0] sm:$0xff]  ;;  %v248_v33 = vld [vmem:[%s1775_s3 + $0x168] sm:$0xff] }
   0xb   :  { %v66_v8 = vadd.f32 %v65_v7, %v64_v6  ;;  %v57_v9 = vld.sshfl [vmem:[#allocation1 + $0x10] sm:$0xff pattern:$0x75316420]  ;;  %v58_v10 = vld.sshfl [vmem:[#allocation1 + $0x18] sm:$0xff pattern:$0x75316420]  ;;  %v1365_v23 = vpop.eup %1159 }
   0xc   :  { %107 = vst [vmem:[#allocation1 + $0x10] ss:$2 sm:$0xff] %v84_v3  ;;  %v69_v11 = vsel %vm63_vm0, %v57_v9, 0.0  ;;  %v70_v12 = vsel %vm63_vm0, %v58_v10, 0.0  ;;  %v75_v32 = vmul.f32 256.0, %v1365_v23  ;;  %v264_v34 = vld [vmem:[%s1775_s3 + $0x1e8] sm:$0xff]  ;;  %vm79_vm1 = vweird.f32 %v1365_v23 }
   0xd   :  { %67 = vadd.xlane.f32.xlu0 %v66_v8  ;;  %v71_v13 = vadd.f32 %v70_v12, %v69_v11  ;;  %v214_v35 = vld [vmem:[%s1775_s3 + $0x58] sm:$0xff]  ;;  %v247_v37 = vld [vmem:[%s1775_s3 + $0x160] sm:$0xff]  ;;  %v213_v39 = vld [vmem:[%s1775_s3 + $0x50] sm:$0xff]  ;;  %v97_v3 = vlaneseq }
   0xe   :  { %v230_v36 = vld [vmem:[%s1775_s3 + $0xd8] sm:$0xff]  ;;  %v263_v38 = vld [vmem:[%s1775_s3 + $0x1e0] sm:$0xff]  ;;  %v229_v40 = vld [vmem:[%s1775_s3 + $0xd0] sm:$0xff]  ;;  %v76_v41 = vsub.f32 1.0, %v75_v32 }
   0xf   :  { %v246_v42 = vld [vmem:[%s1775_s3 + $0x158] sm:$0xff]  ;;  %v212_v44 = vld [vmem:[%s1775_s3 + $0x48] sm:$0xff]  ;;  %v245_v46 = vld [vmem:[%s1775_s3 + $0x150] sm:$0xff]  ;;  %v98_v11 = vand.u32 127, %v97_v3 }
  0x10   :  { %v262_v43 = vld [vmem:[%s1775_s3 + $0x1d8] sm:$0xff]  ;;  %v228_v45 = vld [vmem:[%s1775_s3 + $0xc8] sm:$0xff]  ;;  %v261_v47 = vld [vmem:[%s1775_s3 + $0x1d0] sm:$0xff]  ;;  %v77_v50 = vmul.f32 %v1365_v23, %v76_v41 }
  0x11   :  { %v108_v15 = vld.sshfl [vmem:[#allocation1] sm:$0xff pattern:$0x75316420]  ;;  %v109_v16 = vld.sshfl [vmem:[#allocation1 + $0x8] sm:$0xff pattern:$0x75316420] }
  0x12   :  { %1113 = vmatpush.msk.msra.mxu0 %vm63_vm0, %v108_v15  ;;  %1115 = vmatpush.msk.msra.mxu1 %vm63_vm0, %v109_v16  ;;  %v211_v48 = vld [vmem:[%s1775_s3 + $0x40] sm:$0xff]  ;;  %v244_v51 = vld [vmem:[%s1775_s3 + $0x148] sm:$0xff]  ;;  %v210_v53 = vld [vmem:[%s1775_s3 + $0x38] sm:$0xff]  ;;  %v78_v59 = vadd.f32 %v1365_v23, %v77_v50 }
  0x13   :  { %v110_v17 = vld.sshfl [vmem:[#allocation1 + $0x10] sm:$0xff pattern:$0x75316420]  ;;  %v111_v18 = vld.sshfl [vmem:[#allocation1 + $0x18] sm:$0xff pattern:$0x75316420] }
  0x14   :  { %1117 = vmatpush.msk.msra.mxu2 %vm63_vm0, %v110_v17  ;;  %1119 = vmatpush.msk.msra.mxu3 %vm63_vm0, %v111_v18  ;;  %v227_v49 = vld [vmem:[%s1775_s3 + $0xc0] sm:$0xff]  ;;  %v260_v52 = vld [vmem:[%s1775_s3 + $0x1c8] sm:$0xff]  ;;  %v226_v54 = vld [vmem:[%s1775_s3 + $0xb8] sm:$0xff]  ;;  %v80_v6 = vsel %vm79_vm1, %v1365_v23, %v78_v59  ;;  %vm1043_vm1 = vcmask 1041408  }
  0x15   :  { %72 = vadd.xlane.f32.xlu0 %v71_v13  ;;  %271 = vmatpush.msrb.mxu0 %v218_v19  ;;  %v243_v55 = vld [vmem:[%s1775_s3 + $0x140] sm:$0xff]  ;;  %v209_v57 = vld [vmem:[%s1775_s3 + $0x30] sm:$0xff]  ;;  %v242_v61 = vld [vmem:[%s1775_s3 + $0x138] sm:$0xff] }
  0x16   :  { %291 = vmatpush.msrb.mxu1 %v234_v20  ;;  %311 = vmatpush.msrb.mxu2 %v250_v26  ;;  %v259_v56 = vld [vmem:[%s1775_s3 + $0x1c0] sm:$0xff]  ;;  %v225_v58 = vld [vmem:[%s1775_s3 + $0xb0] sm:$0xff]  ;;  %v258_v62 = vld [vmem:[%s1775_s3 + $0x1b8] sm:$0xff] }
  0x17   :  { %272 = vmatpush.msrb.mxu0 %v217_v21  ;;  %331 = vmatpush.msrb.mxu3 %v266_v28  ;;  %v208_v63 = vld [vmem:[%s1775_s3 + $0x28] sm:$0xff]  ;;  %v241_v1 = vld [vmem:[%s1775_s3 + $0x130] sm:$0xff]  ;;  %v207_v4 = vld [vmem:[%s1775_s3 + $0x20] sm:$0xff] }
  0x18   :  { %292 = vmatpush.msrb.mxu1 %v233_v22  ;;  %312 = vmatpush.msrb.mxu2 %v249_v30  ;;  %v224_v0 = vld [vmem:[%s1775_s3 + $0xa8] sm:$0xff]  ;;  %v257_v2 = vld [vmem:[%s1775_s3 + $0x1b0] sm:$0xff]  ;;  %v223_v5 = vld [vmem:[%s1775_s3 + $0xa0] sm:$0xff] }
  0x19   :  { %273 = vmatpush.msrb.mxu0 %v216_v24  ;;  %332 = vmatpush.msrb.mxu3 %v265_v31  ;;  %v240_v7 = vld [vmem:[%s1775_s3 + $0x128] sm:$0xff]  ;;  %v206_v9 = vld [vmem:[%s1775_s3 + $0x18] sm:$0xff]  ;;  %v205_v13 = vld [vmem:[%s1775_s3 + $0x10] sm:$0xff] }
  0x1a   :  { %293 = vmatpush.msrb.mxu1 %v232_v25  ;;  %313 = vmatpush.msrb.mxu2 %v248_v33  ;;  %v256_v8 = vld [vmem:[%s1775_s3 + $0x1a8] sm:$0xff]  ;;  %v222_v10 = vld [vmem:[%s1775_s3 + $0x98] sm:$0xff]  ;;  %v221_v14 = vld [vmem:[%s1775_s3 + $0x90] sm:$0xff] }
  0x1b   :  { %274 = vmatpush.msrb.mxu0 %v215_v27  ;;  %333 = vmatpush.msrb.mxu3 %v264_v34  ;;  %v204_v20 = vld [vmem:[%s1775_s3 + $0x8] sm:$0xff]  ;;  %v239_v22 = vld [vmem:[%s1775_s3 + $0x120] sm:$0xff]  ;;  %v238_v26 = vld [vmem:[%s1775_s3 + $0x118] sm:$0xff] }
  0x1c   :  { %294 = vmatpush.msrb.mxu1 %v231_v29  ;;  %314 = vmatpush.msrb.mxu2 %v247_v37  ;;  %v220_v21 = vld [vmem:[%s1775_s3 + $0x88] sm:$0xff]  ;;  %v255_v23 = vld [vmem:[%s1775_s3 + $0x1a0] sm:$0xff]  ;;  %v254_v27 = vld [vmem:[%s1775_s3 + $0x198] sm:$0xff] }
  0x1d   :  { %275 = vmatpush.msrb.mxu0 %v214_v35  ;;  %334 = vmatpush.msrb.mxu3 %v263_v38  ;;  %v203_v24 = vld [vmem:[%s1775_s3] sm:$0xff]  ;;  %v237_v28 = vld [vmem:[%s1775_s3 + $0x110] sm:$0xff]  ;;  %v236_v30 = vld [vmem:[%s1775_s3 + $0x108] sm:$0xff] }
  0x1e   :  { %295 = vmatpush.msrb.mxu1 %v230_v36  ;;  %315 = vmatpush.msrb.mxu2 %v246_v42  ;;  %v219_v25 = vld [vmem:[%s1775_s3 + $0x80] sm:$0xff]  ;;  %v253_v29 = vld [vmem:[%s1775_s3 + $0x190] sm:$0xff]  ;;  %v252_v31 = vld [vmem:[%s1775_s3 + $0x188] sm:$0xff] }
  0x1f   :  { %276 = vmatpush.msrb.mxu0 %v213_v39  ;;  %335 = vmatpush.msrb.mxu3 %v262_v43  ;;  %v235_v32 = vld [vmem:[%s1775_s3 + $0x100] sm:$0xff]  ;;  %v419_v34 = vld [vmem:[%s1779_s7 + $0x18] sm:$0xff]  ;;  %v418_v35 = vld [vmem:[%s1779_s7 + $0x10] sm:$0xff] }
  0x20   :  { %296 = vmatpush.msrb.mxu1 %v229_v40  ;;  %316 = vmatpush.msrb.mxu2 %v245_v46  ;;  %v251_v33 = vld [vmem:[%s1775_s3 + $0x180] sm:$0xff]  ;;  %v417_v36 = vld [vmem:[%s1779_s7 + $0x8] sm:$0xff] }
  0x21   :  { %277 = vmatpush.msrb.mxu0 %v212_v44  ;;  %336 = vmatpush.msrb.mxu3 %v261_v47  ;;  %v85_v37 = vld [vmem:[%s1774_s2] sm:$0xf]  ;;  %v384_v59 = vld [vmem:[%s1781_s9 + $0x8] sm:$0xff] }
  0x22   :  { %297 = vmatpush.msrb.mxu1 %v228_v45  ;;  %317 = vmatpush.msrb.mxu2 %v244_v51  ;;  %v87_v38 = vperm.slane %v85_v37, 0  ;;  %v88_v39 = vperm.slane %v85_v37, 1  ;;  %v89_v44 = vperm.slane %v85_v37, 2  ;;  %v90_v45 = vperm.slane %v85_v37, 3  ;;  %v416_v50 = vld [vmem:[%s1779_s7] sm:$0xff] }
  0x23   :  { %278 = vmatpush.msrb.mxu0 %v211_v48  ;;  %337 = vmatpush.msrb.mxu3 %v260_v52  ;;  %v414_v51 = vld [vmem:[%s1777_s5] sm:$0xff]  ;;  %v354_v52 = vld [vmem:[%s1778_s6 + $0x18] sm:$0xff] }
  0x24   :  { %298 = vmatpush.msrb.mxu1 %v227_v49  ;;  %318 = vmatpush.msrb.mxu2 %v243_v55  ;;  %v352_v55 = vld [vmem:[%s1778_s6 + $0x8] sm:$0xff] }
  0x25   :  { %279 = vmatpush.msrb.mxu0 %v210_v53  ;;  %338 = vmatpush.msrb.mxu3 %v259_v56  ;;  %v415_v53 = vld [vmem:[%s1777_s5 + $0x8] sm:$0xff]  ;;  %v351_v56 = vld [vmem:[%s1778_s6] sm:$0xff] }
  0x26   :  { %299 = vmatpush.msrb.mxu1 %v226_v54  ;;  %319 = vmatpush.msrb.mxu2 %v242_v61  ;;  %v353_v54 = vld [vmem:[%s1778_s6 + $0x10] sm:$0xff]  ;;  %s1099_s6 = sshll.u32 %s1255_s26, 4  ;;  %s1100_s6 = int_to_ptr.vmem [resolvable:$true] %s1099_s6 }
  0x27   :  { %280 = vmatpush.msrb.mxu0 %v209_v57  ;;  %339 = vmatpush.msrb.mxu3 %v258_v62  ;;  %v386_v57 = vld [vmem:[%s1781_s9 + $0x18] sm:$0xff] }
  0x28   :  { %300 = vmatpush.msrb.mxu1 %v225_v58  ;;  %320 = vmatpush.msrb.mxu2 %v241_v1  ;;  %v385_v58 = vld [vmem:[%s1781_s9 + $0x10] sm:$0xff] }
  0x29   :  { %281 = vmatpush.msrb.mxu0 %v208_v63  ;;  %340 = vmatpush.msrb.mxu3 %v257_v2 }
  0x2a   :  { %301 = vmatpush.msrb.mxu1 %v224_v0  ;;  %321 = vmatpush.msrb.mxu2 %v240_v7 }
  0x2b   :  { %282 = vmatpush.msrb.mxu0 %v207_v4  ;;  %341 = vmatpush.msrb.mxu3 %v256_v8 }
  0x2c   :  { %302 = vmatpush.msrb.mxu1 %v223_v5  ;;  %322 = vmatpush.msrb.mxu2 %v239_v22  ;;  %v383_v5 = vld [vmem:[%s1781_s9] sm:$0xff] }
  0x2d   :  { %283 = vmatpush.msrb.mxu0 %v206_v9  ;;  %342 = vmatpush.msrb.mxu3 %v255_v23  ;;  %v1617_v9 = vld [vmem:[%s1782_s10 + $0x10] sm:$0xff] }
  0x2e   :  { %303 = vmatpush.msrb.mxu1 %v222_v10  ;;  %323 = vmatpush.msrb.mxu2 %v238_v26  ;;  %v1624_v10 = vld [vmem:[%s1782_s10 + $0x8] sm:$0xff] }
  0x2f   :  { %284 = vmatpush.msrb.mxu0 %v205_v13  ;;  %343 = vmatpush.msrb.mxu3 %v254_v27  ;;  %v1156_v13 = vld [vmem:[%s1780_s8] ss:$0 sm:$0xff]  ;;  %s1253_s8 = smov 64  }
  0x30   :  { %304 = vmatpush.msrb.mxu1 %v221_v14  ;;  %324 = vmatpush.msrb.mxu2 %v237_v28 }
  0x31   :  { %285 = vmatpush.msrb.mxu0 %v204_v20  ;;  %344 = vmatpush.msrb.mxu3 %v253_v29 }
  0x32   :  { %305 = vmatpush.msrb.mxu1 %v220_v21  ;;  %325 = vmatpush.msrb.mxu2 %v236_v30 }
  0x33   :  { %286 = vmatpush.msrb.mxu0 %v203_v24  ;;  %345 = vmatpush.msrb.mxu3 %v252_v31 }
  0x34   :  { %306 = vmatpush.msrb.mxu1 %v219_v25  ;;  %326 = vmatpush.msrb.mxu2 %v235_v32 }
  0x35   :  { %346 = vmatpush.msrb.mxu3 %v251_v33 }
  0x80   :  { %v68_v60 = vpop.xlane.xlu0 %67 }
  0x81   :  { %v81_v12 = vmul.f32 %v80_v6, %v68_v60  ;;  %v1155_v60 = vld [vmem:[%s1776_s4] ss:$0 sm:$0xff] }
  0x83   :  { %v99_v17 = vperm.slane %v81_v12, %v98_v11  ;;  %v1252_v12 = vmov 0.0  }
  0x88   :  { %v73_v15 = vpop.xlane.xlu0 %72 }
  0x89   :  { %v82_v16 = vmul.f32 %v80_v6, %v73_v15  ;;  %v1606_v6 = vld [vmem:[%s1782_s10 + $0x18] sm:$0xff] }
  0x8b   :  { %v100_v18 = vperm.slane %v82_v16, %v98_v11  ;;  %v1629_v11 = vld [vmem:[%s1782_s10] sm:$0xff] }
  0x8c   :  { %v1157_v16 = vld [vmem:[%s1783_s11] ss:$0 sm:$0xff]  ;;  %s1254_s11 = smov 32  }
  0x8d   :  { %v102_v19 = vsel %vm101_vm2, %v100_v18, %v99_v17  ;;  %vm1045_vm2 = vcmask 1043456  }
  0x8e   :  { %1114 = vmatmul.msk.f32.vlgmr.msra.gmra.mxu0 %vm112_vm3, %v102_v19  ;;  %1116 = vmatmul.msk.f32.vlgmr.msra.gmra.mxu1 %vm112_vm3, %v102_v19 }
  0x8f   :  { %1118 = vmatmul.msk.f32.vlgmr.msra.gmra.mxu2 %vm112_vm3, %v102_v19  ;;  %1120 = vmatmul.msk.f32.vlgmr.msra.gmra.mxu3 %vm112_vm3, %v102_v19 }
  0x90   :  { %438 = vmatpush.msra.mxu2 %v419_v34  ;;  %1144 = vmatpush.msra.mxu3 %v419_v34 }
  0x91   :  { %375 = vmatpush.msra.mxu0 %v354_v52  ;;  %406 = vmatpush.msra.mxu1 %v386_v57 }
  0x92   :  { %439 = vmatpush.msra.mxu2 %v418_v35  ;;  %1145 = vmatpush.msra.mxu3 %v418_v35 }
  0x93   :  { %376 = vmatpush.msra.mxu0 %v353_v54  ;;  %407 = vmatpush.msra.mxu1 %v385_v58 }
  0x94   :  { %440 = vmatpush.msra.mxu2 %v417_v36  ;;  %1146 = vmatpush.msra.mxu3 %v417_v36 }
  0x95   :  { %377 = vmatpush.msra.mxu0 %v352_v55  ;;  %408 = vmatpush.msra.mxu1 %v384_v59 }
  0x96   :  { %441 = vmatpush.msra.mxu2 %v416_v50  ;;  %1147 = vmatpush.msra.mxu3 %v416_v50 }
  0x97   :  { %378 = vmatpush.msra.mxu0 %v351_v56  ;;  %409 = vmatpush.msra.mxu1 %v383_v5 }
 0x10b   :  { %v140_v40 = vpop.f32.mrf.mxu0  ;;  %v160_v41 = vpop.f32.mrf.mxu1 }
 0x10c   :  { %v141_v42 = vadd.f32 %v140_v40, %v87_v38  ;;  %v161_v43 = vadd.f32 %v160_v41, %v88_v39 }
 0x10e   :  { %287 = vmatmul.f32.vlgmr.msrb.gmra.mxu0 %v141_v42  ;;  %307 = vmatmul.f32.vlgmr.msrb.gmra.mxu1 %v161_v43 }
 0x10f   :  { %498 = vmatpush.msrb.mxu0 %v1606_v6  ;;  %565 = vmatpush.msrb.mxu1 %v1606_v6 }
 0x111   :  { %499 = vmatpush.msrb.mxu0 %v1617_v9  ;;  %566 = vmatpush.msrb.mxu1 %v1617_v9 }
 0x112   :  { %v180_v46 = vpop.f32.mrf.mxu2  ;;  %v200_v47 = vpop.f32.mrf.mxu3 }
 0x113   :  { %v181_v48 = vadd.f32 %v180_v46, %v89_v44  ;;  %v201_v49 = vadd.f32 %v200_v47, %v90_v45  ;;  %500 = vmatpush.msrb.mxu0 %v1624_v10  ;;  %567 = vmatpush.msrb.mxu1 %v1624_v10 }
 0x115   :  { %327 = vmatmul.f32.vlgmr.msrb.gmra.mxu2 %v181_v48  ;;  %347 = vmatmul.f32.vlgmr.msrb.gmra.mxu3 %v201_v49 }
 0x116   :  { %467 = vmatpush.msrb.mxu3 %v386_v57  ;;  %782 = vmatpush.msrb.mxu2 %v1606_v6 }
 0x117   :  { %501 = vmatpush.msrb.mxu0 %v1629_v11  ;;  %568 = vmatpush.msrb.mxu1 %v1629_v11 }
 0x118   :  { %468 = vmatpush.msrb.mxu3 %v385_v58  ;;  %783 = vmatpush.msrb.mxu2 %v1617_v9 }
 0x11a   :  { %469 = vmatpush.msrb.mxu3 %v384_v59  ;;  %784 = vmatpush.msrb.mxu2 %v1624_v10 }
 0x11c   :  { %470 = vmatpush.msrb.mxu3 %v383_v5  ;;  %785 = vmatpush.msrb.mxu2 %v1629_v11 }
 0x11d   :  { %1123 = vmatmul.msk.f32.vlgmr.msra.gmra.mxu2 %vm359_vm4, %v414_v51  ;;  %1124 = vmatmul.msk.f32.vlgmr.msra.gmra.mxu3 %vm359_vm4, %v415_v53 }
 0x11e   :  { %849 = vmatpush.msra.mxu3 %v1606_v6 }
 0x120   :  { %850 = vmatpush.msra.mxu3 %v1617_v9 }
 0x122   :  { %851 = vmatpush.msra.mxu3 %v1624_v10 }
 0x124   :  { %852 = vmatpush.msra.mxu3 %v1629_v11 }
 0x18b   :  { %v288_v61 = vpop.f32.mrf.mxu0  ;;  %v308_v63 = vpop.f32.mrf.mxu1 }
 0x18c   :  { %v289_v62 = vadd.f32 %v1155_v60, %v288_v61 }
 0x18e   :  { %v309_v0 = vadd.f32 %v308_v63, %v289_v62 }
 0x198   :  { %v328_v1 = vpop.f32.mrf.mxu2  ;;  %v348_v3 = vpop.f32.mrf.mxu3 }
 0x199   :  { %v329_v2 = vadd.f32 %v328_v1, %v309_v0 }
 0x19b   :  { %v349_v4 = vadd.f32 %v348_v3, %v329_v2 }
 0x19d   :  { %1121 = vmatmul.msk.f32.vlgmr.msra.gmra.mxu0 %vm359_vm4, %v349_v4 }
 0x19e   :  { %638 = vmatpush.msra.mxu0 %v1606_v6 }
 0x1a0   :  { %v443_v7 = vpop.f32.mrf.mxu2  ;;  %v446_v8 = vpop.f32.mrf.mxu3  ;;  %639 = vmatpush.msra.mxu0 %v1617_v9 }
 0x1a1   :  { %1125 = vmatmul.msk.f32.vlgmr.msrb.gmra.mxu3 %vm359_vm4, %v443_v7 }
 0x1a2   :  { %640 = vmatpush.msra.mxu0 %v1624_v10 }
 0x1a4   :  { %641 = vmatpush.msra.mxu0 %v1629_v11 }
 0x1a5   :  { %502 = vmatmul.f32.vlgmr.msrb.gmra.mxu0 %v1252_v12 }
 0x1a6   :  { %920 = vmatpush.msrb.mxu0 %v1606_v6 }
 0x1a8   :  { %921 = vmatpush.msrb.mxu0 %v1617_v9 }
 0x1a9   :  { %1126 = vmatmul.msk.f32.gmra.mxu3 %vm359_vm4, %v446_v8 }
 0x1aa   :  { %922 = vmatpush.msrb.mxu0 %v1624_v10 }
 0x1ac   :  { %923 = vmatpush.msrb.mxu0 %v1629_v11 }
 0x21a   :  { %v380_v14 = vpop.f32.mrf.mxu0 }
 0x21b   :  { %v381_v15 = vadd.f32 %v1156_v13, %v380_v14 }
 0x21d   :  { %1122 = vmatmul.msk.f32.vlgmr.msra.gmra.mxu1 %vm359_vm4, %v381_v15 }
 0x21e   :  { %711 = vmatpush.msra.mxu1 %v1606_v6 }
 0x220   :  { %712 = vmatpush.msra.mxu1 %v1617_v9 }
 0x222   :  { %713 = vmatpush.msra.mxu1 %v1624_v10  ;;  %v503_v20 = vpop.f32.mrf.mxu0 }
 0x224   :  { %714 = vmatpush.msra.mxu1 %v1629_v11  ;;  %v472_v19 = vpop.f32.mrf.mxu3 }
 0x29a   :  { %v411_v17 = vpop.f32.mrf.mxu1 }
 0x29b   :  { %v1660_v18 = vadd.f32 %v1157_v16, %v411_v17 }
 0x29d   :  { %v482_v21 = vadd.f32 %v472_v19, %v1660_v18  ;;  %v545_v22 = vrot.slane %v1660_v18, 6  ;;  %v617_v23 = vrot.slane %v1660_v18, 4  ;;  %v690_v24 = vrot.slane %v1660_v18, 2 }
 0x29f   :  { %v506_v25 = vadd.f32 %v503_v20, %v482_v21  ;;  %v547_v26 = vadd.f32 %v545_v22, %v472_v19  ;;  %v1670_v27 = vadd.f32 %v617_v23, %v472_v19  ;;  %v1674_v28 = vadd.f32 %v690_v24, %v472_v19 }
 0x2a1   :  { %1161 = vtanh.f32 %v506_v25  ;;  %v1127_v30 = vmul.f32 -1.442695, %v506_v25 }
 0x2a3   :  { %1163 = vpow2.f32 %v1127_v30 }
 0x2a7   :  { %v1162_v29 = vpop.eup %1161 }
 0x2a8   :  { %529 = vrot.lane.b32.xlu1 %v1162_v29, %s1253_s8 }
 0x2a9   :  { %v1164_v31 = vpop.eup %1163 }
 0x2aa   :  { %v510_v32 = vadd.f32 1.0, %v1164_v31 }
 0x2ac   :  { %1165 = vrcp.f32 %v510_v32  ;;  %v522_v38 = vand.u32 2147483648, %v510_v32  ;;  %vm516_vm6 = vweird.f32 %v510_v32  ;;  %v520_v39 = vand.u32 2147483647, %v510_v32 }
 0x2ae   :  { %v523_v41 = vor.u32 1.1754944e-38, %v522_v38  ;;  %vm521_vm8 = vcmp.eq.f32.partialorder %v520_v39, 8.507059e+37 }
 0x2b2   :  { %v1166_v33 = vpop.eup %1165 }
 0x2b3   :  { %v512_v34 = vmul.f32 %v1166_v33, %v510_v32  ;;  %vm517_vm5 = vweird.f32 %v1166_v33 }
 0x2b4   :  { %vm518_vm7 = vmor %vm516_vm6, %vm517_vm5 }
 0x2b5   :  { %v513_v35 = vsub.f32 1.0, %v512_v34 }
 0x2b7   :  { %v514_v36 = vmul.f32 %v1166_v33, %v513_v35 }
 0x2b9   :  { %v515_v37 = vadd.f32 %v1166_v33, %v514_v36 }
 0x2bb   :  { %v519_v40 = vsel %vm518_vm7, %v1166_v33, %v515_v37 }
 0x2bc   :  { %v524_v43 = vsel %vm521_vm8, %v523_v41, %v519_v40  ;;  %vm1047_vm8 = vcmask 1045504  }
 0x2bd   :  { %v527_v45 = vmul.f32 0.0, %v524_v43 }
 0x31a   :  { %v530_v42 = vpop.permute.xlu1 %529 }
 0x31b   :  { %v532_v44 = vmul.f32 %v530_v42, %v524_v43 }
 0x31d   :  { %534 = vrot.lane.b32.xlu1 %v532_v44, %s1254_s11 }
 0x38f   :  { %v535_v46 = vpop.permute.xlu1 %534 }
 0x390   :  { %v537_v47 = vadd.f32 %v535_v46, %v527_v45 }
 0x392   :  { %1167 = vtanh.f32 %v537_v47  ;;  %v598_v7 = vrot.slane %v537_v47, 6 }
 0x398   :  { %v1168_v48 = vpop.eup %1167 }
 0x399   :  { %540 = vrot.lane.b32.xlu2 %v1168_v48, %s1253_s8 }
 0x3f3   :  { %v541_v49 = vpop.permute.xlu2 %540 }
 0x3f4   :  { %v1679_v50 = vmul.f32 %v541_v49, %v524_v43 }
 0x3f6   :  { %549 = vrot.lane.b32.xlu2 %v1679_v50, %s1254_s11 }
 0x450   :  { %v550_v51 = vpop.permute.xlu2 %549 }
 0x451   :  { %1128 = vmatmul.msk.f32.vlgmr.msrb.gmra.mxu1 %vm359_vm4, %v550_v51 }
 0x452   :  { %991 = vmatpush.msrb.mxu1 %v1606_v6 }
 0x454   :  { %992 = vmatpush.msrb.mxu1 %v1617_v9 }
 0x456   :  { %993 = vmatpush.msrb.mxu1 %v1624_v10 }
 0x458   :  { %994 = vmatpush.msrb.mxu1 %v1629_v11 }
 0x4ce   :  { %v570_v52 = vpop.f32.mrf.mxu1 }
 0x4cf   :  { %v574_v53 = vrot.slane %v570_v52, 6 }
 0x4d1   :  { %v576_v54 = vadd.f32 %v574_v53, %v547_v26 }
 0x4d3   :  { %1169 = vtanh.f32 %v576_v54  ;;  %v1129_v56 = vmul.f32 -1.442695, %v576_v54 }
 0x4d5   :  { %1171 = vpow2.f32 %v1129_v56 }
 0x4d9   :  { %v1170_v55 = vpop.eup %1169 }
 0x4da   :  { %602 = vrot.lane.b32.xlu0 %v1170_v55, %s1253_s8 }
 0x4db   :  { %v1172_v57 = vpop.eup %1171 }
 0x4dc   :  { %v580_v58 = vadd.f32 1.0, %v1172_v57 }
 0x4de   :  { %1173 = vrcp.f32 %v580_v58  ;;  %v592_v0 = vand.u32 2147483648, %v580_v58  ;;  %vm586_vm10 = vweird.f32 %v580_v58  ;;  %v590_v1 = vand.u32 2147483647, %v580_v58 }
 0x4e0   :  { %v593_v3 = vor.u32 1.1754944e-38, %v592_v0  ;;  %vm591_vm12 = vcmp.eq.f32.partialorder %v590_v1, 8.507059e+37 }
 0x4e4   :  { %v1174_v59 = vpop.eup %1173 }
 0x4e5   :  { %v582_v60 = vmul.f32 %v1174_v59, %v580_v58  ;;  %vm587_vm9 = vweird.f32 %v1174_v59 }
 0x4e6   :  { %vm588_vm11 = vmor %vm586_vm10, %vm587_vm9 }
 0x4e7   :  { %v583_v61 = vsub.f32 1.0, %v582_v60 }
 0x4e9   :  { %v584_v62 = vmul.f32 %v1174_v59, %v583_v61 }
 0x4eb   :  { %v585_v63 = vadd.f32 %v1174_v59, %v584_v62 }
 0x4ed   :  { %v589_v2 = vsel %vm588_vm11, %v1174_v59, %v585_v63 }
 0x4ee   :  { %v594_v5 = vsel %vm591_vm12, %v593_v3, %v589_v2 }
 0x4ef   :  { %v600_v8 = vmul.f32 %v598_v7, %v594_v5 }
 0x54c   :  { %v603_v4 = vpop.permute.xlu0 %602 }
 0x54d   :  { %v605_v6 = vmul.f32 %v603_v4, %v594_v5 }
 0x54f   :  { %607 = vrot.lane.b32.xlu1 %v605_v6, %s1254_s11 }
 0x5c1   :  { %v608_v9 = vpop.permute.xlu1 %607 }
 0x5c2   :  { %v610_v10 = vadd.f32 %v608_v9, %v600_v8 }
 0x5c4   :  { %1175 = vtanh.f32 %v610_v10  ;;  %v671_v40 = vrot.slane %v610_v10, 6 }
 0x5ca   :  { %v1176_v11 = vpop.eup %1175 }
 0x5cb   :  { %613 = vrot.lane.b32.xlu2 %v1176_v11, %s1253_s8 }
 0x625   :  { %v614_v12 = vpop.permute.xlu2 %613 }
 0x626   :  { %v616_v13 = vmul.f32 %v614_v12, %v594_v5 }
 0x628   :  { %v621_v14 = vrot.slane %v616_v13, 2  ;;  %v1044_v47 = vsel %vm1043_vm1, %v1679_v50, %v616_v13 }
 0x62a   :  { %622 = vrot.lane.b32.xlu1 %v621_v14, %s1254_s11 }
 0x69c   :  { %v623_v15 = vpop.permute.xlu1 %622 }
 0x69d   :  { %1130 = vmatmul.msk.f32.vlgmr.msra.gmra.mxu0 %vm359_vm4, %v623_v15  ;;  %v1711_v15 = vpop.f32.mrf.mxu3 }
 0x71a   :  { %v643_v16 = vpop.f32.mrf.mxu0 }
 0x71b   :  { %v647_v17 = vrot.slane %v643_v16, 4  ;;  %v763_v16 = vadd.f32 %v1711_v15, %v1660_v18  ;;  %v1054_v18 = vld [vmem:[%s1784_s12 + $0x10] sm:$0xff] }
 0x71d   :  { %v649_v19 = vadd.f32 %v647_v17, %v1670_v27 }
 0x71f   :  { %1177 = vtanh.f32 %v649_v19  ;;  %v1131_v21 = vmul.f32 -1.442695, %v649_v19 }
 0x721   :  { %1179 = vpow2.f32 %v1131_v21 }
 0x725   :  { %v1178_v20 = vpop.eup %1177 }
 0x726   :  { %675 = vrot.lane.b32.xlu2 %v1178_v20, %s1253_s8 }
 0x727   :  { %v1180_v25 = vpop.eup %1179 }
 0x728   :  { %v653_v26 = vadd.f32 1.0, %v1180_v25 }
 0x72a   :  { %1181 = vrcp.f32 %v653_v26  ;;  %v665_v34 = vand.u32 2147483648, %v653_v26  ;;  %vm659_vm14 = vweird.f32 %v653_v26  ;;  %v663_v35 = vand.u32 2147483647, %v653_v26 }
 0x72c   :  { %v666_v36 = vor.u32 1.1754944e-38, %v665_v34  ;;  %vm664_vm0 = vcmp.eq.f32.partialorder %v663_v35, 8.507059e+37 }
 0x730   :  { %v1182_v29 = vpop.eup %1181 }
 0x731   :  { %v655_v30 = vmul.f32 %v1182_v29, %v653_v26  ;;  %vm660_vm13 = vweird.f32 %v1182_v29 }
 0x732   :  { %vm661_vm15 = vmor %vm659_vm14, %vm660_vm13 }
 0x733   :  { %v656_v31 = vsub.f32 1.0, %v655_v30 }
 0x735   :  { %v657_v32 = vmul.f32 %v1182_v29, %v656_v31 }
 0x737   :  { %v658_v33 = vadd.f32 %v1182_v29, %v657_v32 }
 0x739   :  { %v662_v27 = vsel %vm661_vm15, %v1182_v29, %v658_v33 }
 0x73a   :  { %v667_v38 = vsel %vm664_vm0, %v666_v36, %v662_v27 }
 0x73b   :  { %v673_v41 = vmul.f32 %v671_v40, %v667_v38 }
 0x780   :  { %v676_v37 = vpop.permute.xlu2 %675 }
 0x781   :  { %v678_v39 = vmul.f32 %v676_v37, %v667_v38 }
 0x783   :  { %680 = vrot.lane.b32.xlu1 %v678_v39, %s1254_s11 }
 0x7f5   :  { %v681_v42 = vpop.permute.xlu1 %680 }
 0x7f6   :  { %v683_v43 = vadd.f32 %v681_v42, %v673_v41 }
 0x7f8   :  { %1183 = vtanh.f32 %v683_v43  ;;  %v744_v5 = vrot.slane %v683_v43, 6 }
 0x7fe   :  { %v1184_v44 = vpop.eup %1183 }
 0x7ff   :  { %686 = vrot.lane.b32.xlu2 %v1184_v44, %s1253_s8 }
 0x859   :  { %v687_v45 = vpop.permute.xlu2 %686 }
 0x85a   :  { %v689_v46 = vmul.f32 %v687_v45, %v667_v38 }
 0x85c   :  { %v694_v48 = vrot.slane %v689_v46, 4  ;;  %v1046_v49 = vsel %vm1045_vm2, %v1044_v47, %v689_v46 }
 0x85e   :  { %695 = vrot.lane.b32.xlu0 %v694_v48, %s1254_s11 }
 0x8d0   :  { %v696_v51 = vpop.permute.xlu0 %695 }
 0x8d1   :  { %1132 = vmatmul.msk.f32.vlgmr.msra.gmra.mxu1 %vm359_vm4, %v696_v51 }
 0x94e   :  { %v716_v52 = vpop.f32.mrf.mxu1 }
 0x94f   :  { %v720_v53 = vrot.slane %v716_v52, 2 }
 0x951   :  { %v722_v54 = vadd.f32 %v720_v53, %v1674_v28 }
 0x953   :  { %1185 = vtanh.f32 %v722_v54  ;;  %v1133_v56 = vmul.f32 -1.442695, %v722_v54 }
 0x955   :  { %1187 = vpow2.f32 %v1133_v56 }
 0x959   :  { %v1186_v55 = vpop.eup %1185 }
 0x95a   :  { %748 = vrot.lane.b32.xlu1 %v1186_v55, %s1253_s8 }
 0x95b   :  { %v1188_v57 = vpop.eup %1187 }
 0x95c   :  { %v726_v50 = vadd.f32 1.0, %v1188_v57 }
 0x95e   :  { %1189 = vrcp.f32 %v726_v50  ;;  %v738_v63 = vand.u32 2147483648, %v726_v50  ;;  %vm732_vm5 = vweird.f32 %v726_v50  ;;  %v736_v0 = vand.u32 2147483647, %v726_v50 }
 0x960   :  { %v739_v1 = vor.u32 1.1754944e-38, %v738_v63  ;;  %vm737_vm7 = vcmp.eq.f32.partialorder %v736_v0, 8.507059e+37 }
 0x964   :  { %v1190_v58 = vpop.eup %1189 }
 0x965   :  { %v728_v59 = vmul.f32 %v1190_v58, %v726_v50  ;;  %vm733_vm3 = vweird.f32 %v1190_v58 }
 0x966   :  { %vm734_vm6 = vmor %vm732_vm5, %vm733_vm3 }
 0x967   :  { %v729_v60 = vsub.f32 1.0, %v728_v59 }
 0x969   :  { %v730_v61 = vmul.f32 %v1190_v58, %v729_v60 }
 0x96b   :  { %v731_v62 = vadd.f32 %v1190_v58, %v730_v61 }
 0x96d   :  { %v735_v28 = vsel %vm734_vm6, %v1190_v58, %v731_v62 }
 0x96e   :  { %v740_v3 = vsel %vm737_vm7, %v739_v1, %v735_v28 }
 0x96f   :  { %v746_v6 = vmul.f32 %v744_v5, %v740_v3 }
 0x9cc   :  { %v749_v2 = vpop.permute.xlu1 %748 }
 0x9cd   :  { %v751_v4 = vmul.f32 %v749_v2, %v740_v3 }
 0x9cf   :  { %753 = vrot.lane.b32.xlu2 %v751_v4, %s1254_s11 }
 0xa29   :  { %v754_v7 = vpop.permute.xlu2 %753 }
 0xa2a   :  { %v756_v8 = vadd.f32 %v754_v7, %v746_v6 }
 0xa2c   :  { %1191 = vtanh.f32 %v756_v8  ;;  %v812_v40 = vrot.slane %v756_v8, 6 }
 0xa32   :  { %v1192_v9 = vpop.eup %1191 }
 0xa33   :  { %759 = vrot.lane.b32.xlu0 %v1192_v9, %s1253_s8 }
 0xaa5   :  { %v760_v10 = vpop.permute.xlu0 %759 }
 0xaa6   :  { %v762_v11 = vmul.f32 %v760_v10, %v740_v3 }
 0xaa8   :  { %v765_v12 = vrot.slane %v762_v11, 6  ;;  %v1707_v13 = vsel %vm1047_vm8, %v1046_v49, %v762_v11  ;;  %v831_v49 = vadd.f32 %v545_v22, %v1711_v15 }
 0xaaa   :  { %766 = vrot.lane.b32.xlu1 %v765_v12, %s1254_s11  ;;  %v901_v12 = vadd.f32 %v617_v23, %v1711_v15 }
 0xb1c   :  { %v767_v14 = vpop.permute.xlu1 %766 }
 0xb1d   :  { %1134 = vmatmul.msk.f32.vlgmr.msrb.gmra.mxu2 %vm359_vm4, %v767_v14 }
 0xba0   :  { %v787_v17 = vpop.f32.mrf.mxu2 }
 0xba1   :  { %v790_v19 = vadd.f32 %v787_v17, %v763_v16 }
 0xba3   :  { %1193 = vtanh.f32 %v790_v19  ;;  %v1135_v21 = vmul.f32 -1.442695, %v790_v19 }
 0xba5   :  { %1195 = vpow2.f32 %v1135_v21 }
 0xba9   :  { %v1194_v20 = vpop.eup %1193 }
 0xbaa   :  { %816 = vrot.lane.b32.xlu2 %v1194_v20, %s1253_s8 }
 0xbab   :  { %v1196_v25 = vpop.eup %1195 }
 0xbac   :  { %v794_v26 = vadd.f32 1.0, %v1196_v25 }
 0xbae   :  { %1197 = vrcp.f32 %v794_v26  ;;  %v806_v34 = vand.u32 2147483648, %v794_v26  ;;  %vm800_vm10 = vweird.f32 %v794_v26  ;;  %v804_v35 = vand.u32 2147483647, %v794_v26 }
 0xbb0   :  { %v807_v36 = vor.u32 1.1754944e-38, %v806_v34  ;;  %vm805_vm12 = vcmp.eq.f32.partialorder %v804_v35, 8.507059e+37 }
 0xbb4   :  { %v1198_v29 = vpop.eup %1197 }
 0xbb5   :  { %v796_v30 = vmul.f32 %v1198_v29, %v794_v26  ;;  %vm801_vm9 = vweird.f32 %v1198_v29 }
 0xbb6   :  { %vm802_vm11 = vmor %vm800_vm10, %vm801_vm9 }
 0xbb7   :  { %v797_v31 = vsub.f32 1.0, %v796_v30 }
 0xbb9   :  { %v798_v32 = vmul.f32 %v1198_v29, %v797_v31 }
 0xbbb   :  { %v799_v33 = vadd.f32 %v1198_v29, %v798_v32 }
 0xbbd   :  { %v803_v27 = vsel %vm802_vm11, %v1198_v29, %v799_v33 }
 0xbbe   :  { %v808_v38 = vsel %vm805_vm12, %v807_v36, %v803_v27 }
 0xbbf   :  { %v814_v41 = vmul.f32 %v812_v40, %v808_v38 }
 0xc04   :  { %v817_v37 = vpop.permute.xlu2 %816 }
 0xc05   :  { %v819_v39 = vmul.f32 %v817_v37, %v808_v38 }
 0xc07   :  { %821 = vrot.lane.b32.xlu0 %v819_v39, %s1254_s11 }
 0xc79   :  { %v822_v42 = vpop.permute.xlu0 %821 }
 0xc7a   :  { %v824_v43 = vadd.f32 %v822_v42, %v814_v41 }
 0xc7c   :  { %1199 = vtanh.f32 %v824_v43  ;;  %v882_v2 = vrot.slane %v824_v43, 6 }
 0xc82   :  { %v1200_v44 = vpop.eup %1199 }
 0xc83   :  { %827 = vrot.lane.b32.xlu1 %v1200_v44, %s1253_s8 }
 0xcf5   :  { %v828_v45 = vpop.permute.xlu1 %827 }
 0xcf6   :  { %v1718_v46 = vmul.f32 %v828_v45, %v808_v38 }
 0xcf8   :  { %833 = vrot.lane.b32.xlu2 %v1718_v46, %s1254_s11 }
 0xd52   :  { %v834_v47 = vpop.permute.xlu2 %833 }
 0xd53   :  { %1136 = vmatmul.msk.f32.vlgmr.msra.gmra.mxu3 %vm359_vm4, %v834_v47 }
 0xdd6   :  { %v854_v48 = vpop.f32.mrf.mxu3 }
 0xdd7   :  { %v858_v51 = vrot.slane %v854_v48, 6 }
 0xdd9   :  { %v860_v52 = vadd.f32 %v858_v51, %v831_v49  ;;  %v972_v51 = vadd.f32 %v690_v24, %v1711_v15  ;;  %v1053_v24 = vld [vmem:[%s1784_s12 + $0x8] sm:$0xff] }
 0xddb   :  { %1201 = vtanh.f32 %v860_v52  ;;  %v1137_v54 = vmul.f32 -1.442695, %v860_v52 }
 0xddd   :  { %1203 = vpow2.f32 %v1137_v54 }
 0xde1   :  { %v1202_v53 = vpop.eup %1201 }
 0xde2   :  { %886 = vrot.lane.b32.xlu0 %v1202_v53, %s1253_s8 }
 0xde3   :  { %v1204_v55 = vpop.eup %1203 }
 0xde4   :  { %v864_v56 = vadd.f32 1.0, %v1204_v55 }
 0xde6   :  { %1205 = vrcp.f32 %v864_v56  ;;  %v876_v61 = vand.u32 2147483648, %v864_v56  ;;  %vm870_vm14 = vweird.f32 %v864_v56  ;;  %v874_v22 = vand.u32 2147483647, %v864_v56 }
 0xde8   :  { %v877_v63 = vor.u32 1.1754944e-38, %v876_v61  ;;  %vm875_vm0 = vcmp.eq.f32.partialorder %v874_v22, 8.507059e+37 }
 0xdec   :  { %v1206_v57 = vpop.eup %1205 }
 0xded   :  { %v866_v50 = vmul.f32 %v1206_v57, %v864_v56  ;;  %vm871_vm13 = vweird.f32 %v1206_v57 }
 0xdee   :  { %vm872_vm15 = vmor %vm870_vm14, %vm871_vm13 }
 0xdef   :  { %v867_v58 = vsub.f32 1.0, %v866_v50 }
 0xdf1   :  { %v868_v59 = vmul.f32 %v1206_v57, %v867_v58 }
 0xdf3   :  { %v869_v60 = vadd.f32 %v1206_v57, %v868_v59 }
 0xdf5   :  { %v873_v62 = vsel %vm872_vm15, %v1206_v57, %v869_v60  ;;  %v1055_v57 = vld [vmem:[%s1784_s12 + $0x18] sm:$0xff] }
 0xdf6   :  { %v878_v28 = vsel %vm875_vm0, %v877_v63, %v873_v62  ;;  %1082 = vmatpush.msra.mxu2 %v1055_v57 }
 0xdf7   :  { %v884_v3 = vmul.f32 %v882_v2, %v878_v28 }
 0xdf8   :  { %1083 = vmatpush.msra.mxu2 %v1054_v18 }
 0xdfa   :  { %1084 = vmatpush.msra.mxu2 %v1053_v24 }
 0xe54   :  { %v887_v0 = vpop.permute.xlu0 %886 }
 0xe55   :  { %v889_v1 = vmul.f32 %v887_v0, %v878_v28 }
 0xe57   :  { %891 = vrot.lane.b32.xlu1 %v889_v1, %s1254_s11 }
 0xec9   :  { %v892_v4 = vpop.permute.xlu1 %891 }
 0xeca   :  { %v894_v5 = vadd.f32 %v892_v4, %v884_v3 }
 0xecc   :  { %1207 = vtanh.f32 %v894_v5  ;;  %v953_v37 = vrot.slane %v894_v5, 6 }
 0xed2   :  { %v1208_v6 = vpop.eup %1207 }
 0xed3   :  { %897 = vrot.lane.b32.xlu2 %v1208_v6, %s1253_s8 }
 0xf2d   :  { %v898_v7 = vpop.permute.xlu2 %897 }
 0xf2e   :  { %v900_v8 = vmul.f32 %v898_v7, %v878_v28 }
 0xf30   :  { %v903_v9 = vrot.slane %v900_v8, 2  ;;  %v1049_v44 = vsel %vm1043_vm1, %v1718_v46, %v900_v8  ;;  %v1158_v8 = vld [vmem:[%s1785_s13] ss:$0 sm:$0xff]  ;;  %s1256_s13 = smov 128  }
 0xf32   :  { %904 = vrot.lane.b32.xlu0 %v903_v9, %s1254_s11 }
 0xfa4   :  { %v905_v10 = vpop.permute.xlu0 %904 }
 0xfa5   :  { %1138 = vmatmul.msk.f32.vlgmr.msrb.gmra.mxu0 %vm359_vm4, %v905_v10 }
0x1022   :  { %v925_v11 = vpop.f32.mrf.mxu0 }
0x1023   :  { %v929_v14 = vrot.slane %v925_v11, 4 }
0x1025   :  { %v931_v16 = vadd.f32 %v929_v14, %v901_v12 }
0x1027   :  { %1209 = vtanh.f32 %v931_v16  ;;  %v1139_v19 = vmul.f32 -1.442695, %v931_v16 }
0x1029   :  { %1211 = vpow2.f32 %v1139_v19 }
0x102d   :  { %v1210_v17 = vpop.eup %1209 }
0x102e   :  { %957 = vrot.lane.b32.xlu1 %v1210_v17, %s1253_s8 }
0x102f   :  { %v1212_v20 = vpop.eup %1211 }
0x1030   :  { %v935_v21 = vadd.f32 1.0, %v1212_v20 }
0x1032   :  { %1213 = vrcp.f32 %v935_v21  ;;  %v947_v32 = vand.u32 2147483648, %v935_v21  ;;  %vm941_vm5 = vweird.f32 %v935_v21  ;;  %v945_v23 = vand.u32 2147483647, %v935_v21 }
0x1034   :  { %v948_v34 = vor.u32 1.1754944e-38, %v947_v32  ;;  %vm946_vm7 = vcmp.eq.f32.partialorder %v945_v23, 8.507059e+37 }
0x1038   :  { %v1214_v25 = vpop.eup %1213 }
0x1039   :  { %v937_v26 = vmul.f32 %v1214_v25, %v935_v21  ;;  %vm942_vm3 = vweird.f32 %v1214_v25 }
0x103a   :  { %vm943_vm6 = vmor %vm941_vm5, %vm942_vm3 }
0x103b   :  { %v938_v29 = vsub.f32 1.0, %v937_v26 }
0x103d   :  { %v939_v30 = vmul.f32 %v1214_v25, %v938_v29 }
0x103f   :  { %v940_v31 = vadd.f32 %v1214_v25, %v939_v30 }
0x1041   :  { %v944_v33 = vsel %vm943_vm6, %v1214_v25, %v940_v31 }
0x1042   :  { %v949_v27 = vsel %vm946_vm7, %v948_v34, %v944_v33 }
0x1043   :  { %v955_v38 = vmul.f32 %v953_v37, %v949_v27 }
0x10a0   :  { %v958_v35 = vpop.permute.xlu1 %957 }
0x10a1   :  { %v960_v36 = vmul.f32 %v958_v35, %v949_v27 }
0x10a3   :  { %962 = vrot.lane.b32.xlu2 %v960_v36, %s1254_s11 }
0x10fd   :  { %v963_v39 = vpop.permute.xlu2 %962 }
0x10fe   :  { %v965_v40 = vadd.f32 %v963_v39, %v955_v38 }
0x1100   :  { %1215 = vtanh.f32 %v965_v40  ;;  %v1024_v3 = vrot.slane %v965_v40, 6 }
0x1106   :  { %v1216_v41 = vpop.eup %1215 }
0x1107   :  { %968 = vrot.lane.b32.xlu0 %v1216_v41, %s1253_s8 }
0x1179   :  { %v969_v42 = vpop.permute.xlu0 %968 }
0x117a   :  { %v971_v43 = vmul.f32 %v969_v42, %v949_v27 }
0x117c   :  { %v974_v45 = vrot.slane %v971_v43, 4  ;;  %v1050_v47 = vsel %vm1045_vm2, %v1049_v44, %v971_v43 }
0x117e   :  { %975 = vrot.lane.b32.xlu1 %v974_v45, %s1254_s11 }
0x11f0   :  { %v976_v48 = vpop.permute.xlu1 %975 }
0x11f1   :  { %1140 = vmatmul.msk.f32.vlgmr.msrb.gmra.mxu1 %vm359_vm4, %v976_v48 }
0x126e   :  { %v996_v49 = vpop.f32.mrf.mxu1 }
0x126f   :  { %v1000_v52 = vrot.slane %v996_v49, 2 }
0x1271   :  { %v1002_v53 = vadd.f32 %v1000_v52, %v972_v51 }
0x1273   :  { %1217 = vtanh.f32 %v1002_v53  ;;  %v1141_v46 = vmul.f32 -1.442695, %v1002_v53 }
0x1275   :  { %1219 = vpow2.f32 %v1141_v46 }
0x1279   :  { %v1218_v54 = vpop.eup %1217 }
0x127a   :  { %1028 = vrot.lane.b32.xlu2 %v1218_v54, %s1253_s8 }
0x127b   :  { %v1220_v55 = vpop.eup %1219 }
0x127c   :  { %v1006_v56 = vadd.f32 1.0, %v1220_v55 }
0x127e   :  { %1221 = vrcp.f32 %v1006_v56  ;;  %v1018_v61 = vand.u32 2147483648, %v1006_v56  ;;  %vm1012_vm2 = vweird.f32 %v1006_v56  ;;  %v1016_v22 = vand.u32 2147483647, %v1006_v56 }
0x1280   :  { %v1019_v63 = vor.u32 1.1754944e-38, %v1018_v61  ;;  %vm1017_vm10 = vcmp.eq.f32.partialorder %v1016_v22, 8.507059e+37 }
0x1282   :  { %1062 = vrot.lane.b32.xlu2 %v1707_v13, %s1254_s11  ;;  %v1052_v13 = vld [vmem:[%s1784_s12] sm:$0xff] }
0x1283   :  { %1085 = vmatpush.msra.mxu2 %v1052_v13 }
0x1284   :  { %v1222_v15 = vpop.eup %1221 }
0x1285   :  { %v1008_v50 = vmul.f32 %v1222_v15, %v1006_v56  ;;  %vm1013_vm1 = vweird.f32 %v1222_v15 }
0x1286   :  { %vm1014_vm9 = vmor %vm1012_vm2, %vm1013_vm1 }
0x1287   :  { %v1009_v58 = vsub.f32 1.0, %v1008_v50 }
0x1289   :  { %v1010_v59 = vmul.f32 %v1222_v15, %v1009_v58 }
0x128b   :  { %v1011_v60 = vadd.f32 %v1222_v15, %v1010_v59 }
0x128d   :  { %v1015_v62 = vsel %vm1014_vm9, %v1222_v15, %v1011_v60 }
0x128e   :  { %v1020_v28 = vsel %vm1017_vm10, %v1019_v63, %v1015_v62 }
0x128f   :  { %v1026_v4 = vmul.f32 %v1024_v3, %v1020_v28 }
0x12d4   :  { %v1029_v0 = vpop.permute.xlu2 %1028 }
0x12d5   :  { %v1031_v1 = vmul.f32 %v1029_v0, %v1020_v28 }
0x12d7   :  { %1033 = vrot.lane.b32.xlu0 %v1031_v1, %s1254_s11 }
0x12dc   :  { %v1063_v2 = vpop.permute.xlu2 %1062 }
0x12dd   :  { %1142 = vmatmul.msk.f32.vlgmr.msra.gmra.mxu2 %vm359_vm4, %v1063_v2 }
0x1349   :  { %v1034_v5 = vpop.permute.xlu0 %1033 }
0x134a   :  { %v1036_v6 = vadd.f32 %v1034_v5, %v1026_v4 }
0x134c   :  { %1223 = vtanh.f32 %v1036_v6 }
0x1352   :  { %v1224_v7 = vpop.eup %1223 }
0x1353   :  { %1039 = vrot.lane.b32.xlu1 %v1224_v7, %s1253_s8 }
0x1360   :  { %v1087_v9 = vpop.f32.mrf.mxu2 }
0x1361   :  { %v1088_v10 = vadd.f32 %v1158_v8, %v1087_v9 }
0x1363   :  { %1093 = vst [vmem:[#allocation2] sm:$0xff] %v1088_v10 }
0x13c5   :  { %v1040_v11 = vpop.permute.xlu1 %1039 }
0x13c6   :  { %v1042_v12 = vmul.f32 %v1040_v11, %v1020_v28 }
0x13c8   :  { %v1051_v14 = vsel %vm1047_vm8, %v1050_v47, %v1042_v12 }
0x13c9   :  { %1064 = vrot.lane.b32.xlu0 %v1051_v14, %s1254_s11 }
0x143b   :  { %v1065_v16 = vpop.permute.xlu0 %1064 }
0x143c   :  { %1143 = vmatmul.msk.f32.gmra.mxu2 %vm359_vm4, %v1065_v16 }
0x14bf   :  { %v1090_v17 = vpop.f32.mrf.mxu2 }
0x14c0   :  { %v1091_v19 = vadd.f32 %v1158_v8, %v1090_v17 }
0x14c2   :  { %1094 = vst [vmem:[#allocation2 + $0x8] sm:$0xff] %v1091_v19 }
0x14c3   :  { %1107 = dma.vmem_to_hbm [thread:$0]  %s1100_s6, 256, %s1102_s28, [#allocation3], %s1256_s13, %s1256_s13, %s1257_s29  }
0x14c4   :  { %1249 = dma.done.wait [#allocation3], 256  }
0x14c5   :  { %1250 = vsyncadd [#allocation3], 4294967040 }
0x14c6   :  { %1112 = vsyncpa [#allocation3], 1 }

</bundles_post_ra>
